<compile_context>
chip_gen: v5e
topology: v5e:2x2
jax: 0.10.0
libtpu: 0.0.40
codegen_flags: <defaults>
</compile_context>

<pallas_src>
import numpy as np
import jax
import jax.numpy as jnp
from jax.experimental import pallas as pl
from jax.experimental.pallas import tpu as pltpu

MAX_TOKENS = 128


def _layer_norm(y, gamma, beta, eps=1e-5):
    mu = jnp.mean(y, axis=-1, keepdims=True)
    var = jnp.mean(jnp.square(y - mu), axis=-1, keepdims=True)
    return (y - mu) * jax.lax.rsqrt(var + eps) * gamma + beta


def _make_kernel(B_blk, S, E, H, nh):
    hd = E // nh
    G = B_blk * nh          # attention batch = (batch-in-block) x heads
    R = B_blk * S           # rows presented to every dense matmul
    scale = 1.0 / np.sqrt(hd)
    bf16 = jnp.bfloat16

    def kernel(x_ref, win_ref, bin_ref, wout_ref, bout_ref,
               w1_ref, b1_ref, w2_ref, b2_ref,
               g1_ref, be1_ref, g2_ref, be2_ref,
               gf_ref, bf_ref, out_ref,
               x_s, q_s, k_s, v_s, ctx_s):
        l = pl.program_id(1)
        n_layers = pl.num_programs(1)

        # Load the residual stream for this batch block on the first layer.
        @pl.when(l == 0)
        def _():
            x_s[...] = x_ref[...].reshape(R, E)

        x = x_s[...]                                   # (R, E) f32 residual

        # ----- fused QKV projection: one lane-dense matmul, bf16 ops / f32 acc
        qkv = jnp.dot(x.astype(bf16), win_ref[0],
                      preferred_element_type=jnp.float32) + bin_ref[0]   # (R, 3E)

        # Stage per-(batch, head) q/k/v slabs through VMEM so the attention is
        # a single head-batched contraction (no per-head matmuls, no concat).
        for b in range(B_blk):
            rows = slice(b * S, (b + 1) * S)
            for h in range(nh):
                g = b * nh + h
                c = h * hd
                q_s[g] = qkv[rows, c:c + hd] * scale
                k_s[g] = qkv[rows, E + c:E + c + hd]
                v_s[g] = qkv[rows, 2 * E + c:2 * E + c + hd]

        q = q_s[...]                                   # (G, S, hd)
        k = k_s[...]
        v = v_s[...]
        sc = jnp.einsum('gqd,gkd->gqk', q, k,
                        preferred_element_type=jnp.float32)              # (G, S, S)
        sc = sc - jnp.max(sc, axis=-1, keepdims=True)
        p = jnp.exp(sc)
        p = p * pl.reciprocal(jnp.sum(p, axis=-1, keepdims=True), approx=True)
        ctx = jnp.einsum('gqk,gkd->gqd', p, v,
                         preferred_element_type=jnp.float32)             # (G, S, hd)

        # Write head outputs straight into a lane-dense (R, E) slab.
        for b in range(B_blk):
            for h in range(nh):
                ctx_s[b * S:(b + 1) * S, h * hd:(h + 1) * hd] = ctx[b * nh + h]

        attn = jnp.dot(ctx_s[...].astype(bf16), wout_ref[0],
                       preferred_element_type=jnp.float32) + bout_ref[0]  # (R, E)

        x = _layer_norm(x + attn, g1_ref[0], be1_ref[0])

        # ----- feed forward (relu activation)
        h1 = jnp.maximum(
            jnp.dot(x.astype(bf16), w1_ref[0],
                    preferred_element_type=jnp.float32) + b1_ref[0], 0.0)
        ff = jnp.dot(h1.astype(bf16), w2_ref[0],
                     preferred_element_type=jnp.float32) + b2_ref[0]
        x = _layer_norm(x + ff, g2_ref[0], be2_ref[0])

        x_s[...] = x

        # Final LayerNorm + writeback after the last encoder layer.
        @pl.when(l == n_layers - 1)
        def _():
            y = _layer_norm(x, gf_ref[...], bf_ref[...])
            out_ref[...] = y.reshape(B_blk, S, E)

    return kernel


def transformer_forward(x_sbe, params):
    """x_sbe: (S, B, E) float32, seq-first like PyTorch default."""
    S, B, E = x_sbe.shape
    L = params["win"].shape[0]
    H = params["w1"].shape[1]
    nh = params["num_heads"]
    assert E % nh == 0
    hd = E // nh

    x = x_sbe
    if params["pos"] is not None:
        # Faithful to the PyTorch module: it slices dim 1 of x (batch here).
        x = x + params["pos"][:, :B, :]
    xb = jnp.transpose(x, (1, 0, 2)).astype(jnp.float32)       # (B, S, E)

    # Fold batch into the compute block.  Keep a small leading grid axis
    # (2 blocks when possible) so v7x's two TensorCores both get work, while
    # each layer's weights are DMA'd once per (batch block, layer) only.
    NB = 2 if (B % 2 == 0 and B >= 2) else 1
    B_blk = B // NB
    R = B_blk * S
    G = B_blk * nh

    # Host-side weight prep: pre-transpose to contraction-major and cast the
    # matmul operands to bf16 (accumulation stays f32 in the kernel).
    bf16 = jnp.bfloat16
    win_t = jnp.transpose(params["win"], (0, 2, 1)).astype(bf16)     # (L, E, 3E)
    wout_t = jnp.transpose(params["wout"], (0, 2, 1)).astype(bf16)   # (L, E, E)
    w1_t = jnp.transpose(params["w1"], (0, 2, 1)).astype(bf16)       # (L, E, H)
    w2_t = jnp.transpose(params["w2"], (0, 2, 1)).astype(bf16)       # (L, H, E)

    kernel = _make_kernel(B_blk, S, E, H, nh)

    def per_layer(shape_tail):
        n = len(shape_tail)
        return pl.BlockSpec((1,) + shape_tail,
                            lambda b, l, _n=n: (l,) + (0,) * _n)

    # Explicit VMEM budget from the block footprint (headroom x4) so the
    # pipeline stays fully double-buffered on every generation, clamped to a
    # range that is safe on v5e/v6e (128 MiB VMEM) and v7x (64 MiB / TC).
    weight_bytes = 2 * (3 * E * E + E * E + 2 * E * H)          # bf16 weights
    small_bytes = 4 * (3 * E + E + H + E + 4 * E + 2 * E)       # biases + LN params
    act_bytes = 4 * B_blk * S * E                               # in / out blocks
    scratch_bytes = 4 * (2 * R * E + 3 * G * S * hd)
    footprint = 2 * (weight_bytes + small_bytes + 2 * act_bytes) + scratch_bytes
    vmem_limit = int(min(64 * 2 ** 20, max(32 * 2 ** 20, 4 * footprint)))

    out = pl.pallas_call(
        kernel,
        out_shape=jax.ShapeDtypeStruct((B, S, E), jnp.float32),
        grid_spec=pltpu.PrefetchScalarGridSpec(
            num_scalar_prefetch=0,
            grid=(NB, L),                                  # layer axis last (carry)
            in_specs=[
                pl.BlockSpec((B_blk, S, E), lambda b, l: (b, 0, 0)),   # x
                per_layer((E, 3 * E)),                             # in_proj W^T
                per_layer((1, 3 * E)),                             # in_proj b
                per_layer((E, E)),                                 # out_proj W^T
                per_layer((1, E)),                                 # out_proj b
                per_layer((E, H)),                                 # linear1 W^T
                per_layer((1, H)),                                 # linear1 b
                per_layer((H, E)),                                 # linear2 W^T
                per_layer((1, E)),                                 # linear2 b
                per_layer((1, E)),                                 # norm1 gamma
                per_layer((1, E)),                                 # norm1 beta
                per_layer((1, E)),                                 # norm2 gamma
                per_layer((1, E)),                                 # norm2 beta
                pl.BlockSpec((1, E), lambda b, l: (0, 0)),         # final gamma
                pl.BlockSpec((1, E), lambda b, l: (0, 0)),         # final beta
            ],
            out_specs=pl.BlockSpec((B_blk, S, E), lambda b, l: (b, 0, 0)),
            scratch_shapes=[
                pltpu.VMEM((R, E), jnp.float32),       # residual stream carry
                pltpu.VMEM((G, S, hd), jnp.float32),   # q (head-batched)
                pltpu.VMEM((G, S, hd), jnp.float32),   # k
                pltpu.VMEM((G, S, hd), jnp.float32),   # v
                pltpu.VMEM((R, E), jnp.float32),       # attention context slab
            ],
        ),
        compiler_params=pltpu.CompilerParams(
            dimension_semantics=("parallel", "arbitrary"),
            vmem_limit_bytes=vmem_limit),
    )(xb, win_t, params["bin"], wout_t, params["bout"],
      w1_t, params["b1"], w2_t, params["b2"],
      params["g1"], params["be1"], params["g2"], params["be2"],
      params["gf"], params["bf"])

    return jnp.transpose(out, (1, 0, 2))                       # back to (S, B, E)


def init_params(key, E, nh, H, L, use_pos):
    ks = jax.random.split(key, 10)

    def nrm(k, shape, s):
        return (s * jax.random.normal(k, shape)).astype(jnp.float32)

    p = dict(num_heads=nh)
    p["pos"] = (jax.random.normal(ks[0], (1, MAX_TOKENS, E), jnp.float32)
                if use_pos else None)
    p["win"] = nrm(ks[1], (L, 3 * E, E), 0.1)
    p["bin"] = nrm(ks[2], (L, 1, 3 * E), 0.02)
    p["wout"] = nrm(ks[3], (L, E, E), 0.1)
    p["bout"] = nrm(ks[4], (L, 1, E), 0.02)
    p["w1"] = nrm(ks[5], (L, H, E), 0.1)
    p["b1"] = nrm(ks[6], (L, 1, H), 0.02)
    p["w2"] = nrm(ks[7], (L, E, H), 0.1)
    p["b2"] = nrm(ks[8], (L, 1, E), 0.02)
    # LayerNorm params use PyTorch default init (weight=1, bias=0).
    p["g1"] = jnp.ones((L, 1, E), jnp.float32)
    p["be1"] = jnp.zeros((L, 1, E), jnp.float32)
    p["g2"] = jnp.ones((L, 1, E), jnp.float32)
    p["be2"] = jnp.zeros((L, 1, E), jnp.float32)
    p["gf"] = jnp.ones((1, E), jnp.float32)
    p["bf"] = jnp.zeros((1, E), jnp.float32)
    return p


def reference_forward(x_sbe, params):
    """Pure-JAX f32 reference mirroring nn.TransformerEncoderLayer (post-norm, relu)."""
    S, B, E = x_sbe.shape
    nh = params["num_heads"]
    hd = E // nh
    L = params["win"].shape[0]
    P = jax.lax.Precision.HIGHEST

    x = x_sbe
    if params["pos"] is not None:
        x = x + params["pos"][:, :B, :]

    def ln(y, g, b, eps=1e-5):
        mu = y.mean(-1, keepdims=True)
        var = ((y - mu) ** 2).mean(-1, keepdims=True)
        return (y - mu) / jnp.sqrt(var + eps) * g + b

    for l in range(L):
        qkv = jnp.einsum('sbe,fe->sbf', x, params["win"][l],
                         precision=P) + params["bin"][l, 0]
        q, k, v = jnp.split(qkv, 3, axis=-1)
        q = q.reshape(S, B, nh, hd) / np.sqrt(hd)
        k = k.reshape(S, B, nh, hd)
        v = v.reshape(S, B, nh, hd)
        sc = jnp.einsum('qbhd,kbhd->bhqk', q, k, precision=P)
        pr = jax.nn.softmax(sc, axis=-1)
        attn = jnp.einsum('bhqk,kbhd->qbhd', pr, v, precision=P).reshape(S, B, E)
        attn = jnp.einsum('sbe,fe->sbf', attn, params["wout"][l],
                          precision=P) + params["bout"][l, 0]
        x = ln(x + attn, params["g1"][l, 0], params["be1"][l, 0])
        h = jax.nn.relu(jnp.einsum('sbe,he->sbh', x, params["w1"][l],
                                   precision=P) + params["b1"][l, 0])
        ff = jnp.einsum('sbh,eh->sbe', h, params["w2"][l],
                        precision=P) + params["b2"][l, 0]
        x = ln(x + ff, params["g2"][l, 0], params["be2"][l, 0])
    return ln(x, params["gf"][0], params["bf"][0])


if __name__ == "__main__":
    # Small config consistent with the module: Transformer(embed_dim=32,
    # num_heads=4, hidden_dim=64, num_layers=2, dropout=0.0,
    # use_pos_encoding=True, activation_fct='relu')
    embed_dim, num_heads, hidden_dim, num_layers = 32, 4, 64, 2
    S, B = 8, 2

    key = jax.random.PRNGKey(0)
    kx, kp = jax.random.split(key)
    x = jax.random.normal(kx, (S, B, embed_dim), jnp.float32)
    params = init_params(kp, embed_dim, num_heads, hidden_dim, num_layers,
                         use_pos=True)

    out = transformer_forward(x, params)
    out = jax.block_until_ready(out)
    assert out.shape == (S, B, embed_dim)

    ref = reference_forward(x, params)
    err = float(jnp.max(jnp.abs(out - ref)))
    # Kernel uses bf16 MXU operands (f32 accumulate) across 2 layers of
    # matmuls + LayerNorms; reference is f32 Precision.HIGHEST -> relaxed tol.
    assert err < 2e-1, f"max abs err {err}"
    print("KERNEL_OK")
</pallas_src>

<mosaic_0001>
module attributes {stable_mosaic.version = 11 : i64} {
  func.func @kernel(%arg0: i32, %arg1: i32, %arg2: memref<1x8x32xf32, #tpu.memory_space<vmem>>, %arg3: memref<1x32x96xbf16, #tpu.memory_space<vmem>>, %arg4: memref<1x1x96xf32, #tpu.memory_space<vmem>>, %arg5: memref<1x32x32xbf16, #tpu.memory_space<vmem>>, %arg6: memref<1x1x32xf32, #tpu.memory_space<vmem>>, %arg7: memref<1x32x64xbf16, #tpu.memory_space<vmem>>, %arg8: memref<1x1x64xf32, #tpu.memory_space<vmem>>, %arg9: memref<1x64x32xbf16, #tpu.memory_space<vmem>>, %arg10: memref<1x1x32xf32, #tpu.memory_space<vmem>>, %arg11: memref<1x1x32xf32, #tpu.memory_space<vmem>>, %arg12: memref<1x1x32xf32, #tpu.memory_space<vmem>>, %arg13: memref<1x1x32xf32, #tpu.memory_space<vmem>>, %arg14: memref<1x1x32xf32, #tpu.memory_space<vmem>>, %arg15: memref<1x32xf32, #tpu.memory_space<vmem>>, %arg16: memref<1x32xf32, #tpu.memory_space<vmem>>, %arg17: memref<1x8x32xf32, #tpu.memory_space<vmem>>, %arg18: memref<8x32xf32, #tpu.memory_space<vmem>>, %arg19: memref<4x8x8xf32, #tpu.memory_space<vmem>>, %arg20: memref<4x8x8xf32, #tpu.memory_space<vmem>>, %arg21: memref<4x8x8xf32, #tpu.memory_space<vmem>>, %arg22: memref<8x32xf32, #tpu.memory_space<vmem>>) attributes {dimension_semantics = [#tpu.dimension_semantics<parallel>, #tpu.dimension_semantics<arbitrary>], iteration_bounds = array<i64: 2, 2>, scalar_prefetch = 0 : i64, scratch_operands = 5 : i64, tpu.core_type = #tpu.core_type<tc>, window_params = [{transform_indices = @transform_0, window_bounds = array<i64: 1, 8, 32>}, {transform_indices = @transform_1, window_bounds = array<i64: 1, 32, 96>}, {transform_indices = @transform_2, window_bounds = array<i64: 1, 1, 96>}, {transform_indices = @transform_3, window_bounds = array<i64: 1, 32, 32>}, {transform_indices = @transform_4, window_bounds = array<i64: 1, 1, 32>}, {transform_indices = @transform_5, window_bounds = array<i64: 1, 32, 64>}, {transform_indices = @transform_6, window_bounds = array<i64: 1, 1, 64>}, {transform_indices = @transform_7, window_bounds = array<i64: 1, 64, 32>}, {transform_indices = @transform_8, window_bounds = array<i64: 1, 1, 32>}, {transform_indices = @transform_9, window_bounds = array<i64: 1, 1, 32>}, {transform_indices = @transform_10, window_bounds = array<i64: 1, 1, 32>}, {transform_indices = @transform_11, window_bounds = array<i64: 1, 1, 32>}, {transform_indices = @transform_12, window_bounds = array<i64: 1, 1, 32>}, {pipeline_mode = #tpu.pipeline_mode<synchronous>, transform_indices = @transform_13, window_bounds = array<i64: 1, 32>}, {pipeline_mode = #tpu.pipeline_mode<synchronous>, transform_indices = @transform_14, window_bounds = array<i64: 1, 32>}, {transform_indices = @transform_15, window_bounds = array<i64: 1, 8, 32>}]} {
    %c0_i32 = arith.constant 0 : i32
    %0 = arith.cmpi eq, %arg1, %c0_i32 : i32
    %1 = arith.extui %0 : i1 to i32
    %c0_i32_0 = arith.constant 0 : i32
    %2 = arith.cmpi ne, %1, %c0_i32_0 : i32
    scf.if %2 {
      %c0_112 = arith.constant 0 : index
      %c0_113 = arith.constant 0 : index
      %c0_114 = arith.constant 0 : index
      %180 = vector.load %arg2[%c0_112, %c0_113, %c0_114] : memref<1x8x32xf32, #tpu.memory_space<vmem>>, vector<1x8x32xf32>
      %181 = vector.shape_cast %180 : vector<1x8x32xf32> to vector<8x32xf32>
      %c0_115 = arith.constant 0 : index
      %c0_116 = arith.constant 0 : index
      %182 = vector.load %arg18[%c0_115, %c0_116] : memref<8x32xf32, #tpu.memory_space<vmem>>, vector<8x32xf32>
      tpu.vector_store %arg18[%c0_115, %c0_116], %181 {strides = array<i32>} : memref<8x32xf32, #tpu.memory_space<vmem>>, vector<8x32xf32>,
    } else {
    }
    %c0 = arith.constant 0 : index
    %c0_1 = arith.constant 0 : index
    %3 = vector.load %arg18[%c0, %c0_1] : memref<8x32xf32, #tpu.memory_space<vmem>>, vector<8x32xf32>
    %4 = arith.truncf %3 : vector<8x32xf32> to vector<8x32xbf16>
    %c0_2 = arith.constant 0 : index
    %c0_3 = arith.constant 0 : index
    %c0_4 = arith.constant 0 : index
    %5 = vector.load %arg3[%c0_2, %c0_3, %c0_4] : memref<1x32x96xbf16, #tpu.memory_space<vmem>>, vector<1x32x96xbf16>
    %6 = vector.shape_cast %5 : vector<1x32x96xbf16> to vector<32x96xbf16>
    %cst = arith.constant dense<0.000000e+00> : vector<8x96xf32>
    %7 = tpu.matmul %4, %6, %cst {dimension_numbers = #tpu.dot_dimension_numbers<[1], [0], [0], [1], [0, 0, 1, 1], [], []>} : vector<8x32xbf16>, vector<32x96xbf16>, vector<8x96xf32> -> vector<8x96xf32>
    %c0_5 = arith.constant 0 : index
    %c0_6 = arith.constant 0 : index
    %c0_7 = arith.constant 0 : index
    %8 = vector.load %arg4[%c0_5, %c0_6, %c0_7] : memref<1x1x96xf32, #tpu.memory_space<vmem>>, vector<1x1x96xf32>
    %9 = vector.shape_cast %8 : vector<1x1x96xf32> to vector<1x96xf32>
    %10 = vector.broadcast %9 : vector<1x96xf32> to vector<8x96xf32>
    %11 = arith.addf %7, %10 : vector<8x96xf32>
    %12 = vector.extract_strided_slice %11 {offsets = [0, 0], sizes = [8, 8], strides = [1, 1]} : vector<8x96xf32> to vector<8x8xf32>
    %cst_8 = arith.constant 0.353553385 : f32
    %13 = vector.broadcast %cst_8 : f32 to vector<8x8xf32>
    %14 = arith.mulf %12, %13 : vector<8x8xf32>
    %c0_9 = arith.constant 0 : index
    %c0_10 = arith.constant 0 : index
    %c0_11 = arith.constant 0 : index
    %15 = vector.load %arg19[%c0_9, %c0_10, %c0_11] : memref<4x8x8xf32, #tpu.memory_space<vmem>>, vector<1x8x8xf32>
    %16 = vector.shape_cast %15 : vector<1x8x8xf32> to vector<8x8xf32>
    %17 = vector.shape_cast %14 : vector<8x8xf32> to vector<1x8x8xf32>
    tpu.vector_store %arg19[%c0_9, %c0_10, %c0_11], %17 {strides = array<i32>} : memref<4x8x8xf32, #tpu.memory_space<vmem>>, vector<1x8x8xf32>,
    %18 = vector.extract_strided_slice %11 {offsets = [0, 32], sizes = [8, 8], strides = [1, 1]} : vector<8x96xf32> to vector<8x8xf32>
    %c0_12 = arith.constant 0 : index
    %c0_13 = arith.constant 0 : index
    %c0_14 = arith.constant 0 : index
    %19 = vector.load %arg20[%c0_12, %c0_13, %c0_14] : memref<4x8x8xf32, #tpu.memory_space<vmem>>, vector<1x8x8xf32>
    %20 = vector.shape_cast %19 : vector<1x8x8xf32> to vector<8x8xf32>
    %21 = vector.shape_cast %18 : vector<8x8xf32> to vector<1x8x8xf32>
    tpu.vector_store %arg20[%c0_12, %c0_13, %c0_14], %21 {strides = array<i32>} : memref<4x8x8xf32, #tpu.memory_space<vmem>>, vector<1x8x8xf32>,
    %22 = vector.extract_strided_slice %11 {offsets = [0, 64], sizes = [8, 8], strides = [1, 1]} : vector<8x96xf32> to vector<8x8xf32>
    %c0_15 = arith.constant 0 : index
    %c0_16 = arith.constant 0 : index
    %c0_17 = arith.constant 0 : index
    %23 = vector.load %arg21[%c0_15, %c0_16, %c0_17] : memref<4x8x8xf32, #tpu.memory_space<vmem>>, vector<1x8x8xf32>
    %24 = vector.shape_cast %23 : vector<1x8x8xf32> to vector<8x8xf32>
    %25 = vector.shape_cast %22 : vector<8x8xf32> to vector<1x8x8xf32>
    tpu.vector_store %arg21[%c0_15, %c0_16, %c0_17], %25 {strides = array<i32>} : memref<4x8x8xf32, #tpu.memory_space<vmem>>, vector<1x8x8xf32>,
    %26 = vector.extract_strided_slice %11 {offsets = [0, 8], sizes = [8, 8], strides = [1, 1]} : vector<8x96xf32> to vector<8x8xf32>
    %cst_18 = arith.constant 0.353553385 : f32
    %27 = vector.broadcast %cst_18 : f32 to vector<8x8xf32>
    %28 = arith.mulf %26, %27 : vector<8x8xf32>
    %c1 = arith.constant 1 : index
    %c0_19 = arith.constant 0 : index
    %c0_20 = arith.constant 0 : index
    %29 = vector.load %arg19[%c1, %c0_19, %c0_20] : memref<4x8x8xf32, #tpu.memory_space<vmem>>, vector<1x8x8xf32>
    %30 = vector.shape_cast %29 : vector<1x8x8xf32> to vector<8x8xf32>
    %31 = vector.shape_cast %28 : vector<8x8xf32> to vector<1x8x8xf32>
    tpu.vector_store %arg19[%c1, %c0_19, %c0_20], %31 {strides = array<i32>} : memref<4x8x8xf32, #tpu.memory_space<vmem>>, vector<1x8x8xf32>,
    %32 = vector.extract_strided_slice %11 {offsets = [0, 40], sizes = [8, 8], strides = [1, 1]} : vector<8x96xf32> to vector<8x8xf32>
    %c1_21 = arith.constant 1 : index
    %c0_22 = arith.constant 0 : index
    %c0_23 = arith.constant 0 : index
    %33 = vector.load %arg20[%c1_21, %c0_22, %c0_23] : memref<4x8x8xf32, #tpu.memory_space<vmem>>, vector<1x8x8xf32>
    %34 = vector.shape_cast %33 : vector<1x8x8xf32> to vector<8x8xf32>
    %35 = vector.shape_cast %32 : vector<8x8xf32> to vector<1x8x8xf32>
    tpu.vector_store %arg20[%c1_21, %c0_22, %c0_23], %35 {strides = array<i32>} : memref<4x8x8xf32, #tpu.memory_space<vmem>>, vector<1x8x8xf32>,
    %36 = vector.extract_strided_slice %11 {offsets = [0, 72], sizes = [8, 8], strides = [1, 1]} : vector<8x96xf32> to vector<8x8xf32>
    %c1_24 = arith.constant 1 : index
    %c0_25 = arith.constant 0 : index
    %c0_26 = arith.constant 0 : index
    %37 = vector.load %arg21[%c1_24, %c0_25, %c0_26] : memref<4x8x8xf32, #tpu.memory_space<vmem>>, vector<1x8x8xf32>
    %38 = vector.shape_cast %37 : vector<1x8x8xf32> to vector<8x8xf32>
    %39 = vector.shape_cast %36 : vector<8x8xf32> to vector<1x8x8xf32>
    tpu.vector_store %arg21[%c1_24, %c0_25, %c0_26], %39 {strides = array<i32>} : memref<4x8x8xf32, #tpu.memory_space<vmem>>, vector<1x8x8xf32>,
    %40 = vector.extract_strided_slice %11 {offsets = [0, 16], sizes = [8, 8], strides = [1, 1]} : vector<8x96xf32> to vector<8x8xf32>
    %cst_27 = arith.constant 0.353553385 : f32
    %41 = vector.broadcast %cst_27 : f32 to vector<8x8xf32>
    %42 = arith.mulf %40, %41 : vector<8x8xf32>
    %c2 = arith.constant 2 : index
    %c0_28 = arith.constant 0 : index
    %c0_29 = arith.constant 0 : index
    %43 = vector.load %arg19[%c2, %c0_28, %c0_29] : memref<4x8x8xf32, #tpu.memory_space<vmem>>, vector<1x8x8xf32>
    %44 = vector.shape_cast %43 : vector<1x8x8xf32> to vector<8x8xf32>
    %45 = vector.shape_cast %42 : vector<8x8xf32> to vector<1x8x8xf32>
    tpu.vector_store %arg19[%c2, %c0_28, %c0_29], %45 {strides = array<i32>} : memref<4x8x8xf32, #tpu.memory_space<vmem>>, vector<1x8x8xf32>,
    %46 = vector.extract_strided_slice %11 {offsets = [0, 48], sizes = [8, 8], strides = [1, 1]} : vector<8x96xf32> to vector<8x8xf32>
    %c2_30 = arith.constant 2 : index
    %c0_31 = arith.constant 0 : index
    %c0_32 = arith.constant 0 : index
    %47 = vector.load %arg20[%c2_30, %c0_31, %c0_32] : memref<4x8x8xf32, #tpu.memory_space<vmem>>, vector<1x8x8xf32>
    %48 = vector.shape_cast %47 : vector<1x8x8xf32> to vector<8x8xf32>
    %49 = vector.shape_cast %46 : vector<8x8xf32> to vector<1x8x8xf32>
    tpu.vector_store %arg20[%c2_30, %c0_31, %c0_32], %49 {strides = array<i32>} : memref<4x8x8xf32, #tpu.memory_space<vmem>>, vector<1x8x8xf32>,
    %50 = vector.extract_strided_slice %11 {offsets = [0, 80], sizes = [8, 8], strides = [1, 1]} : vector<8x96xf32> to vector<8x8xf32>
    %c2_33 = arith.constant 2 : index
    %c0_34 = arith.constant 0 : index
    %c0_35 = arith.constant 0 : index
    %51 = vector.load %arg21[%c2_33, %c0_34, %c0_35] : memref<4x8x8xf32, #tpu.memory_space<vmem>>, vector<1x8x8xf32>
    %52 = vector.shape_cast %51 : vector<1x8x8xf32> to vector<8x8xf32>
    %53 = vector.shape_cast %50 : vector<8x8xf32> to vector<1x8x8xf32>
    tpu.vector_store %arg21[%c2_33, %c0_34, %c0_35], %53 {strides = array<i32>} : memref<4x8x8xf32, #tpu.memory_space<vmem>>, vector<1x8x8xf32>,
    %54 = vector.extract_strided_slice %11 {offsets = [0, 24], sizes = [8, 8], strides = [1, 1]} : vector<8x96xf32> to vector<8x8xf32>
    %cst_36 = arith.constant 0.353553385 : f32
    %55 = vector.broadcast %cst_36 : f32 to vector<8x8xf32>
    %56 = arith.mulf %54, %55 : vector<8x8xf32>
    %c3 = arith.constant 3 : index
    %c0_37 = arith.constant 0 : index
    %c0_38 = arith.constant 0 : index
    %57 = vector.load %arg19[%c3, %c0_37, %c0_38] : memref<4x8x8xf32, #tpu.memory_space<vmem>>, vector<1x8x8xf32>
    %58 = vector.shape_cast %57 : vector<1x8x8xf32> to vector<8x8xf32>
    %59 = vector.shape_cast %56 : vector<8x8xf32> to vector<1x8x8xf32>
    tpu.vector_store %arg19[%c3, %c0_37, %c0_38], %59 {strides = array<i32>} : memref<4x8x8xf32, #tpu.memory_space<vmem>>, vector<1x8x8xf32>,
    %60 = vector.extract_strided_slice %11 {offsets = [0, 56], sizes = [8, 8], strides = [1, 1]} : vector<8x96xf32> to vector<8x8xf32>
    %c3_39 = arith.constant 3 : index
    %c0_40 = arith.constant 0 : index
    %c0_41 = arith.constant 0 : index
    %61 = vector.load %arg20[%c3_39, %c0_40, %c0_41] : memref<4x8x8xf32, #tpu.memory_space<vmem>>, vector<1x8x8xf32>
    %62 = vector.shape_cast %61 : vector<1x8x8xf32> to vector<8x8xf32>
    %63 = vector.shape_cast %60 : vector<8x8xf32> to vector<1x8x8xf32>
    tpu.vector_store %arg20[%c3_39, %c0_40, %c0_41], %63 {strides = array<i32>} : memref<4x8x8xf32, #tpu.memory_space<vmem>>, vector<1x8x8xf32>,
    %64 = vector.extract_strided_slice %11 {offsets = [0, 88], sizes = [8, 8], strides = [1, 1]} : vector<8x96xf32> to vector<8x8xf32>
    %c3_42 = arith.constant 3 : index
    %c0_43 = arith.constant 0 : index
    %c0_44 = arith.constant 0 : index
    %65 = vector.load %arg21[%c3_42, %c0_43, %c0_44] : memref<4x8x8xf32, #tpu.memory_space<vmem>>, vector<1x8x8xf32>
    %66 = vector.shape_cast %65 : vector<1x8x8xf32> to vector<8x8xf32>
    %67 = vector.shape_cast %64 : vector<8x8xf32> to vector<1x8x8xf32>
    tpu.vector_store %arg21[%c3_42, %c0_43, %c0_44], %67 {strides = array<i32>} : memref<4x8x8xf32, #tpu.memory_space<vmem>>, vector<1x8x8xf32>,
    %c0_45 = arith.constant 0 : index
    %c0_46 = arith.constant 0 : index
    %c0_47 = arith.constant 0 : index
    %68 = vector.load %arg19[%c0_45, %c0_46, %c0_47] : memref<4x8x8xf32, #tpu.memory_space<vmem>>, vector<4x8x8xf32>
    %c0_48 = arith.constant 0 : index
    %c0_49 = arith.constant 0 : index
    %c0_50 = arith.constant 0 : index
    %69 = vector.load %arg20[%c0_48, %c0_49, %c0_50] : memref<4x8x8xf32, #tpu.memory_space<vmem>>, vector<4x8x8xf32>
    %c0_51 = arith.constant 0 : index
    %c0_52 = arith.constant 0 : index
    %c0_53 = arith.constant 0 : index
    %70 = vector.load %arg21[%c0_51, %c0_52, %c0_53] : memref<4x8x8xf32, #tpu.memory_space<vmem>>, vector<4x8x8xf32>
    "tpu.trace_start"() <{level = 10 : i32, message = "gqd,gkd->gqk"}> : () -> ()
    %cst_54 = arith.constant dense<0.000000e+00> : vector<4x8x8xf32>
    %71 = tpu.matmul %68, %69, %cst_54 {dimension_numbers = #tpu.dot_dimension_numbers<[2], [2], [1], [1], [0, 0, 0, 1, 1, 1], [0], [0]>} : vector<4x8x8xf32>, vector<4x8x8xf32>, vector<4x8x8xf32> -> vector<4x8x8xf32>
    "tpu.trace_stop"() : () -> ()
    %cst_55 = arith.constant dense<0xFF800000> : vector<4x8xf32>
    %72 = vector.multi_reduction <maximumf>, %71, %cst_55 [2] : vector<4x8x8xf32> to vector<4x8xf32>
    %73 = vector.shape_cast %72 : vector<4x8xf32> to vector<4x8x1xf32>
    %74 = vector.broadcast %73 : vector<4x8x1xf32> to vector<4x8x8xf32>
    %75 = arith.subf %71, %74 : vector<4x8x8xf32>
    %76 = math.exp %75 : vector<4x8x8xf32>
    %cst_56 = arith.constant dense<0.000000e+00> : vector<4x8xf32>
    %77 = vector.multi_reduction <add>, %76, %cst_56 [2] : vector<4x8x8xf32> to vector<4x8xf32>
    %78 = vector.shape_cast %77 : vector<4x8xf32> to vector<4x8x1xf32>
    %79 = tpu.reciprocal %78 {approx = true} : vector<4x8x1xf32> -> vector<4x8x1xf32>
    %80 = vector.broadcast %79 : vector<4x8x1xf32> to vector<4x8x8xf32>
    %81 = arith.mulf %76, %80 : vector<4x8x8xf32>
    "tpu.trace_start"() <{level = 10 : i32, message = "gqk,gkd->gqd"}> : () -> ()
    %cst_57 = arith.constant dense<0.000000e+00> : vector<4x8x8xf32>
    %82 = tpu.matmul %81, %70, %cst_57 {dimension_numbers = #tpu.dot_dimension_numbers<[2], [1], [1], [2], [0, 0, 0, 1, 1, 2], [0], [0]>} : vector<4x8x8xf32>, vector<4x8x8xf32>, vector<4x8x8xf32> -> vector<4x8x8xf32>
    "tpu.trace_stop"() : () -> ()
    %83 = vector.extract_strided_slice %82 {offsets = [0, 0, 0], sizes = [1, 8, 8], strides = [1, 1, 1]} : vector<4x8x8xf32> to vector<1x8x8xf32>
    %84 = vector.shape_cast %83 : vector<1x8x8xf32> to vector<8x8xf32>
    %c0_58 = arith.constant 0 : index
    %c0_59 = arith.constant 0 : index
    %85 = vector.load %arg22[%c0_58, %c0_59] : memref<8x32xf32, #tpu.memory_space<vmem>>, vector<8x8xf32>
    tpu.vector_store %arg22[%c0_58, %c0_59], %84 {strides = array<i32>} : memref<8x32xf32, #tpu.memory_space<vmem>>, vector<8x8xf32>,
    %86 = vector.extract_strided_slice %82 {offsets = [1, 0, 0], sizes = [1, 8, 8], strides = [1, 1, 1]} : vector<4x8x8xf32> to vector<1x8x8xf32>
    %87 = vector.shape_cast %86 : vector<1x8x8xf32> to vector<8x8xf32>
    %c0_60 = arith.constant 0 : index
    %c8 = arith.constant 8 : index
    %88 = vector.load %arg22[%c0_60, %c8] : memref<8x32xf32, #tpu.memory_space<vmem>>, vector<8x8xf32>
    tpu.vector_store %arg22[%c0_60, %c8], %87 {strides = array<i32>} : memref<8x32xf32, #tpu.memory_space<vmem>>, vector<8x8xf32>,
    %89 = vector.extract_strided_slice %82 {offsets = [2, 0, 0], sizes = [1, 8, 8], strides = [1, 1, 1]} : vector<4x8x8xf32> to vector<1x8x8xf32>
    %90 = vector.shape_cast %89 : vector<1x8x8xf32> to vector<8x8xf32>
    %c0_61 = arith.constant 0 : index
    %c16 = arith.constant 16 : index
    %91 = vector.load %arg22[%c0_61, %c16] : memref<8x32xf32, #tpu.memory_space<vmem>>, vector<8x8xf32>
    tpu.vector_store %arg22[%c0_61, %c16], %90 {strides = array<i32>} : memref<8x32xf32, #tpu.memory_space<vmem>>, vector<8x8xf32>,
    %92 = vector.extract_strided_slice %82 {offsets = [3, 0, 0], sizes = [1, 8, 8], strides = [1, 1, 1]} : vector<4x8x8xf32> to vector<1x8x8xf32>
    %93 = vector.shape_cast %92 : vector<1x8x8xf32> to vector<8x8xf32>
    %c0_62 = arith.constant 0 : index
    %c24 = arith.constant 24 : index
    %94 = vector.load %arg22[%c0_62, %c24] : memref<8x32xf32, #tpu.memory_space<vmem>>, vector<8x8xf32>
    tpu.vector_store %arg22[%c0_62, %c24], %93 {strides = array<i32>} : memref<8x32xf32, #tpu.memory_space<vmem>>, vector<8x8xf32>,
    %c0_63 = arith.constant 0 : index
    %c0_64 = arith.constant 0 : index
    %95 = vector.load %arg22[%c0_63, %c0_64] : memref<8x32xf32, #tpu.memory_space<vmem>>, vector<8x32xf32>
    %96 = arith.truncf %95 : vector<8x32xf32> to vector<8x32xbf16>
    %c0_65 = arith.constant 0 : index
    %c0_66 = arith.constant 0 : index
    %c0_67 = arith.constant 0 : index
    %97 = vector.load %arg5[%c0_65, %c0_66, %c0_67] : memref<1x32x32xbf16, #tpu.memory_space<vmem>>, vector<1x32x32xbf16>
    %98 = vector.shape_cast %97 : vector<1x32x32xbf16> to vector<32x32xbf16>
    %cst_68 = arith.constant dense<0.000000e+00> : vector<8x32xf32>
    %99 = tpu.matmul %96, %98, %cst_68 {dimension_numbers = #tpu.dot_dimension_numbers<[1], [0], [0], [1], [0, 0, 1, 1], [], []>} : vector<8x32xbf16>, vector<32x32xbf16>, vector<8x32xf32> -> vector<8x32xf32>
    %c0_69 = arith.constant 0 : index
    %c0_70 = arith.constant 0 : index
    %c0_71 = arith.constant 0 : index
    %100 = vector.load %arg6[%c0_69, %c0_70, %c0_71] : memref<1x1x32xf32, #tpu.memory_space<vmem>>, vector<1x1x32xf32>
    %101 = vector.shape_cast %100 : vector<1x1x32xf32> to vector<1x32xf32>
    %102 = vector.broadcast %101 : vector<1x32xf32> to vector<8x32xf32>
    %103 = arith.addf %99, %102 : vector<8x32xf32>
    %104 = arith.addf %3, %103 : vector<8x32xf32>
    %c0_72 = arith.constant 0 : index
    %c0_73 = arith.constant 0 : index
    %c0_74 = arith.constant 0 : index
    %105 = vector.load %arg11[%c0_72, %c0_73, %c0_74] : memref<1x1x32xf32, #tpu.memory_space<vmem>>, vector<1x1x32xf32>
    %106 = vector.shape_cast %105 : vector<1x1x32xf32> to vector<1x32xf32>
    %c0_75 = arith.constant 0 : index
    %c0_76 = arith.constant 0 : index
    %c0_77 = arith.constant 0 : index
    %107 = vector.load %arg12[%c0_75, %c0_76, %c0_77] : memref<1x1x32xf32, #tpu.memory_space<vmem>>, vector<1x1x32xf32>
    %108 = vector.shape_cast %107 : vector<1x1x32xf32> to vector<1x32xf32>
    %cst_78 = arith.constant dense<0.000000e+00> : vector<8xf32>
    %109 = vector.multi_reduction <add>, %104, %cst_78 [1] : vector<8x32xf32> to vector<8xf32>
    %110 = vector.shape_cast %109 : vector<8xf32> to vector<8x1xf32>
    %cst_79 = arith.constant 3.200000e+01 : f32
    %111 = vector.broadcast %cst_79 : f32 to vector<8x1xf32>
    %112 = arith.divf %110, %111 : vector<8x1xf32>
    %113 = vector.broadcast %112 : vector<8x1xf32> to vector<8x32xf32>
    %114 = arith.subf %104, %113 : vector<8x32xf32>
    %115 = arith.mulf %114, %114 : vector<8x32xf32>
    %cst_80 = arith.constant dense<0.000000e+00> : vector<8xf32>
    %116 = vector.multi_reduction <add>, %115, %cst_80 [1] : vector<8x32xf32> to vector<8xf32>
    %117 = vector.shape_cast %116 : vector<8xf32> to vector<8x1xf32>
    %cst_81 = arith.constant 3.200000e+01 : f32
    %118 = vector.broadcast %cst_81 : f32 to vector<8x1xf32>
    %119 = arith.divf %117, %118 : vector<8x1xf32>
    %120 = vector.broadcast %112 : vector<8x1xf32> to vector<8x32xf32>
    %121 = arith.subf %104, %120 : vector<8x32xf32>
    %cst_82 = arith.constant 9.99999974E-6 : f32
    %122 = vector.broadcast %cst_82 : f32 to vector<8x1xf32>
    %123 = arith.addf %119, %122 : vector<8x1xf32>
    %124 = math.rsqrt %123 : vector<8x1xf32>
    %125 = vector.broadcast %124 : vector<8x1xf32> to vector<8x32xf32>
    %126 = arith.mulf %121, %125 : vector<8x32xf32>
    %127 = vector.broadcast %106 : vector<1x32xf32> to vector<8x32xf32>
    %128 = arith.mulf %126, %127 : vector<8x32xf32>
    %129 = vector.broadcast %108 : vector<1x32xf32> to vector<8x32xf32>
    %130 = arith.addf %128, %129 : vector<8x32xf32>
    %131 = arith.truncf %130 : vector<8x32xf32> to vector<8x32xbf16>
    %c0_83 = arith.constant 0 : index
    %c0_84 = arith.constant 0 : index
    %c0_85 = arith.constant 0 : index
    %132 = vector.load %arg7[%c0_83, %c0_84, %c0_85] : memref<1x32x64xbf16, #tpu.memory_space<vmem>>, vector<1x32x64xbf16>
    %133 = vector.shape_cast %132 : vector<1x32x64xbf16> to vector<32x64xbf16>
    %cst_86 = arith.constant dense<0.000000e+00> : vector<8x64xf32>
    %134 = tpu.matmul %131, %133, %cst_86 {dimension_numbers = #tpu.dot_dimension_numbers<[1], [0], [0], [1], [0, 0, 1, 1], [], []>} : vector<8x32xbf16>, vector<32x64xbf16>, vector<8x64xf32> -> vector<8x64xf32>
    %c0_87 = arith.constant 0 : index
    %c0_88 = arith.constant 0 : index
    %c0_89 = arith.constant 0 : index
    %135 = vector.load %arg8[%c0_87, %c0_88, %c0_89] : memref<1x1x64xf32, #tpu.memory_space<vmem>>, vector<1x1x64xf32>
    %136 = vector.shape_cast %135 : vector<1x1x64xf32> to vector<1x64xf32>
    %137 = vector.broadcast %136 : vector<1x64xf32> to vector<8x64xf32>
    %138 = arith.addf %134, %137 : vector<8x64xf32>
    %cst_90 = arith.constant 0.000000e+00 : f32
    %139 = vector.broadcast %cst_90 : f32 to vector<8x64xf32>
    %140 = arith.maximumf %138, %139 : vector<8x64xf32>
    %141 = arith.truncf %140 : vector<8x64xf32> to vector<8x64xbf16>
    %c0_91 = arith.constant 0 : index
    %c0_92 = arith.constant 0 : index
    %c0_93 = arith.constant 0 : index
    %142 = vector.load %arg9[%c0_91, %c0_92, %c0_93] : memref<1x64x32xbf16, #tpu.memory_space<vmem>>, vector<1x64x32xbf16>
    %143 = vector.shape_cast %142 : vector<1x64x32xbf16> to vector<64x32xbf16>
    %cst_94 = arith.constant dense<0.000000e+00> : vector<8x32xf32>
    %144 = tpu.matmul %141, %143, %cst_94 {dimension_numbers = #tpu.dot_dimension_numbers<[1], [0], [0], [1], [0, 0, 1, 1], [], []>} : vector<8x64xbf16>, vector<64x32xbf16>, vector<8x32xf32> -> vector<8x32xf32>
    %c0_95 = arith.constant 0 : index
    %c0_96 = arith.constant 0 : index
    %c0_97 = arith.constant 0 : index
    %145 = vector.load %arg10[%c0_95, %c0_96, %c0_97] : memref<1x1x32xf32, #tpu.memory_space<vmem>>, vector<1x1x32xf32>
    %146 = vector.shape_cast %145 : vector<1x1x32xf32> to vector<1x32xf32>
    %147 = vector.broadcast %146 : vector<1x32xf32> to vector<8x32xf32>
    %148 = arith.addf %144, %147 : vector<8x32xf32>
    %149 = arith.addf %130, %148 : vector<8x32xf32>
    %c0_98 = arith.constant 0 : index
    %c0_99 = arith.constant 0 : index
    %c0_100 = arith.constant 0 : index
    %150 = vector.load %arg13[%c0_98, %c0_99, %c0_100] : memref<1x1x32xf32, #tpu.memory_space<vmem>>, vector<1x1x32xf32>
    %151 = vector.shape_cast %150 : vector<1x1x32xf32> to vector<1x32xf32>
    %c0_101 = arith.constant 0 : index
    %c0_102 = arith.constant 0 : index
    %c0_103 = arith.constant 0 : index
    %152 = vector.load %arg14[%c0_101, %c0_102, %c0_103] : memref<1x1x32xf32, #tpu.memory_space<vmem>>, vector<1x1x32xf32>
    %153 = vector.shape_cast %152 : vector<1x1x32xf32> to vector<1x32xf32>
    %cst_104 = arith.constant dense<0.000000e+00> : vector<8xf32>
    %154 = vector.multi_reduction <add>, %149, %cst_104 [1] : vector<8x32xf32> to vector<8xf32>
    %155 = vector.shape_cast %154 : vector<8xf32> to vector<8x1xf32>
    %cst_105 = arith.constant 3.200000e+01 : f32
    %156 = vector.broadcast %cst_105 : f32 to vector<8x1xf32>
    %157 = arith.divf %155, %156 : vector<8x1xf32>
    %158 = vector.broadcast %157 : vector<8x1xf32> to vector<8x32xf32>
    %159 = arith.subf %149, %158 : vector<8x32xf32>
    %160 = arith.mulf %159, %159 : vector<8x32xf32>
    %cst_106 = arith.constant dense<0.000000e+00> : vector<8xf32>
    %161 = vector.multi_reduction <add>, %160, %cst_106 [1] : vector<8x32xf32> to vector<8xf32>
    %162 = vector.shape_cast %161 : vector<8xf32> to vector<8x1xf32>
    %cst_107 = arith.constant 3.200000e+01 : f32
    %163 = vector.broadcast %cst_107 : f32 to vector<8x1xf32>
    %164 = arith.divf %162, %163 : vector<8x1xf32>
    %165 = vector.broadcast %157 : vector<8x1xf32> to vector<8x32xf32>
    %166 = arith.subf %149, %165 : vector<8x32xf32>
    %cst_108 = arith.constant 9.99999974E-6 : f32
    %167 = vector.broadcast %cst_108 : f32 to vector<8x1xf32>
    %168 = arith.addf %164, %167 : vector<8x1xf32>
    %169 = math.rsqrt %168 : vector<8x1xf32>
    %170 = vector.broadcast %169 : vector<8x1xf32> to vector<8x32xf32>
    %171 = arith.mulf %166, %170 : vector<8x32xf32>
    %172 = vector.broadcast %151 : vector<1x32xf32> to vector<8x32xf32>
    %173 = arith.mulf %171, %172 : vector<8x32xf32>
    %174 = vector.broadcast %153 : vector<1x32xf32> to vector<8x32xf32>
    %175 = arith.addf %173, %174 : vector<8x32xf32>
    %c0_109 = arith.constant 0 : index
    %c0_110 = arith.constant 0 : index
    %176 = vector.load %arg18[%c0_109, %c0_110] : memref<8x32xf32, #tpu.memory_space<vmem>>, vector<8x32xf32>
    tpu.vector_store %arg18[%c0_109, %c0_110], %175 {strides = array<i32>} : memref<8x32xf32, #tpu.memory_space<vmem>>, vector<8x32xf32>,
    %c1_i32 = arith.constant 1 : i32
    %177 = arith.cmpi eq, %arg1, %c1_i32 : i32
    %178 = arith.extui %177 : i1 to i32
    %c0_i32_111 = arith.constant 0 : i32
    %179 = arith.cmpi ne, %178, %c0_i32_111 : i32
    scf.if %179 {
      %c0_112 = arith.constant 0 : index
      %c0_113 = arith.constant 0 : index
      %180 = vector.load %arg15[%c0_112, %c0_113] : memref<1x32xf32, #tpu.memory_space<vmem>>, vector<1x32xf32>
      %c0_114 = arith.constant 0 : index
      %c0_115 = arith.constant 0 : index
      %181 = vector.load %arg16[%c0_114, %c0_115] : memref<1x32xf32, #tpu.memory_space<vmem>>, vector<1x32xf32>
      %cst_116 = arith.constant dense<0.000000e+00> : vector<8xf32>
      %182 = vector.multi_reduction <add>, %175, %cst_116 [1] : vector<8x32xf32> to vector<8xf32>
      %183 = vector.shape_cast %182 : vector<8xf32> to vector<8x1xf32>
      %cst_117 = arith.constant 3.200000e+01 : f32
      %184 = vector.broadcast %cst_117 : f32 to vector<8x1xf32>
      %185 = arith.divf %183, %184 : vector<8x1xf32>
      %186 = vector.broadcast %185 : vector<8x1xf32> to vector<8x32xf32>
      %187 = arith.subf %175, %186 : vector<8x32xf32>
      %188 = arith.mulf %187, %187 : vector<8x32xf32>
      %cst_118 = arith.constant dense<0.000000e+00> : vector<8xf32>
      %189 = vector.multi_reduction <add>, %188, %cst_118 [1] : vector<8x32xf32> to vector<8xf32>
      %190 = vector.shape_cast %189 : vector<8xf32> to vector<8x1xf32>
      %cst_119 = arith.constant 3.200000e+01 : f32
      %191 = vector.broadcast %cst_119 : f32 to vector<8x1xf32>
      %192 = arith.divf %190, %191 : vector<8x1xf32>
      %193 = vector.broadcast %185 : vector<8x1xf32> to vector<8x32xf32>
      %194 = arith.subf %175, %193 : vector<8x32xf32>
      %cst_120 = arith.constant 9.99999974E-6 : f32
      %195 = vector.broadcast %cst_120 : f32 to vector<8x1xf32>
      %196 = arith.addf %192, %195 : vector<8x1xf32>
      %197 = math.rsqrt %196 : vector<8x1xf32>
      %198 = vector.broadcast %197 : vector<8x1xf32> to vector<8x32xf32>
      %199 = arith.mulf %194, %198 : vector<8x32xf32>
      %200 = vector.broadcast %180 : vector<1x32xf32> to vector<8x32xf32>
      %201 = arith.mulf %199, %200 : vector<8x32xf32>
      %202 = vector.broadcast %181 : vector<1x32xf32> to vector<8x32xf32>
      %203 = arith.addf %201, %202 : vector<8x32xf32>
      %204 = vector.shape_cast %203 : vector<8x32xf32> to vector<1x8x32xf32>
      %c0_121 = arith.constant 0 : index
      %c0_122 = arith.constant 0 : index
      %c0_123 = arith.constant 0 : index
      %205 = vector.load %arg17[%c0_121, %c0_122, %c0_123] : memref<1x8x32xf32, #tpu.memory_space<vmem>>, vector<1x8x32xf32>
      tpu.vector_store %arg17[%c0_121, %c0_122, %c0_123], %204 {strides = array<i32>} : memref<1x8x32xf32, #tpu.memory_space<vmem>>, vector<1x8x32xf32>,
    } else {
    }
    return
  }
  func.func @transform_0(%arg0: i32, %arg1: i32) -> (i32, i32, i32) {
    %c0_i32 = arith.constant 0 : i32
    %c0_i32_0 = arith.constant 0 : i32
    %c0_i32_1 = arith.constant 0 : i32
    return %arg0, %c0_i32, %c0_i32_0 : i32, i32, i32
  }
  func.func @transform_1(%arg0: i32, %arg1: i32) -> (i32, i32, i32) {
    %c0_i32 = arith.constant 0 : i32
    %c0_i32_0 = arith.constant 0 : i32
    %c0_i32_1 = arith.constant 0 : i32
    return %arg1, %c0_i32, %c0_i32_0 : i32, i32, i32
  }
  func.func @transform_2(%arg0: i32, %arg1: i32) -> (i32, i32, i32) {
    %c0_i32 = arith.constant 0 : i32
    %c0_i32_0 = arith.constant 0 : i32
    %c0_i32_1 = arith.constant 0 : i32
    return %arg1, %c0_i32, %c0_i32_0 : i32, i32, i32
  }
  func.func @transform_3(%arg0: i32, %arg1: i32) -> (i32, i32, i32) {
    %c0_i32 = arith.constant 0 : i32
    %c0_i32_0 = arith.constant 0 : i32
    %c0_i32_1 = arith.constant 0 : i32
    return %arg1, %c0_i32, %c0_i32_0 : i32, i32, i32
  }
  func.func @transform_4(%arg0: i32, %arg1: i32) -> (i32, i32, i32) {
    %c0_i32 = arith.constant 0 : i32
    %c0_i32_0 = arith.constant 0 : i32
    %c0_i32_1 = arith.constant 0 : i32
    return %arg1, %c0_i32, %c0_i32_0 : i32, i32, i32
  }
  func.func @transform_5(%arg0: i32, %arg1: i32) -> (i32, i32, i32) {
    %c0_i32 = arith.constant 0 : i32
    %c0_i32_0 = arith.constant 0 : i32
    %c0_i32_1 = arith.constant 0 : i32
    return %arg1, %c0_i32, %c0_i32_0 : i32, i32, i32
  }
  func.func @transform_6(%arg0: i32, %arg1: i32) -> (i32, i32, i32) {
    %c0_i32 = arith.constant 0 : i32
    %c0_i32_0 = arith.constant 0 : i32
    %c0_i32_1 = arith.constant 0 : i32
    return %arg1, %c0_i32, %c0_i32_0 : i32, i32, i32
  }
  func.func @transform_7(%arg0: i32, %arg1: i32) -> (i32, i32, i32) {
    %c0_i32 = arith.constant 0 : i32
    %c0_i32_0 = arith.constant 0 : i32
    %c0_i32_1 = arith.constant 0 : i32
    return %arg1, %c0_i32, %c0_i32_0 : i32, i32, i32
  }
  func.func @transform_8(%arg0: i32, %arg1: i32) -> (i32, i32, i32) {
    %c0_i32 = arith.constant 0 : i32
    %c0_i32_0 = arith.constant 0 : i32
    %c0_i32_1 = arith.constant 0 : i32
    return %arg1, %c0_i32, %c0_i32_0 : i32, i32, i32
  }
  func.func @transform_9(%arg0: i32, %arg1: i32) -> (i32, i32, i32) {
    %c0_i32 = arith.constant 0 : i32
    %c0_i32_0 = arith.constant 0 : i32
    %c0_i32_1 = arith.constant 0 : i32
    return %arg1, %c0_i32, %c0_i32_0 : i32, i32, i32
  }
  func.func @transform_10(%arg0: i32, %arg1: i32) -> (i32, i32, i32) {
    %c0_i32 = arith.constant 0 : i32
    %c0_i32_0 = arith.constant 0 : i32
    %c0_i32_1 = arith.constant 0 : i32
    return %arg1, %c0_i32, %c0_i32_0 : i32, i32, i32
  }
  func.func @transform_11(%arg0: i32, %arg1: i32) -> (i32, i32, i32) {
    %c0_i32 = arith.constant 0 : i32
    %c0_i32_0 = arith.constant 0 : i32
    %c0_i32_1 = arith.constant 0 : i32
    return %arg1, %c0_i32, %c0_i32_0 : i32, i32, i32
  }
  func.func @transform_12(%arg0: i32, %arg1: i32) -> (i32, i32, i32) {
    %c0_i32 = arith.constant 0 : i32
    %c0_i32_0 = arith.constant 0 : i32
    %c0_i32_1 = arith.constant 0 : i32
    return %arg1, %c0_i32, %c0_i32_0 : i32, i32, i32
  }
  func.func @transform_13(%arg0: i32, %arg1: i32) -> (i32, i32) {
    %c0_i32 = arith.constant 0 : i32
    %c0_i32_0 = arith.constant 0 : i32
    %c0_i32_1 = arith.constant 0 : i32
    return %c0_i32, %c0_i32_0 : i32, i32
  }
  func.func @transform_14(%arg0: i32, %arg1: i32) -> (i32, i32) {
    %c0_i32 = arith.constant 0 : i32
    %c0_i32_0 = arith.constant 0 : i32
    %c0_i32_1 = arith.constant 0 : i32
    return %c0_i32, %c0_i32_0 : i32, i32
  }
  func.func @transform_15(%arg0: i32, %arg1: i32) -> (i32, i32, i32) {
    %c0_i32 = arith.constant 0 : i32
    %c0_i32_0 = arith.constant 0 : i32
    %c0_i32_1 = arith.constant 0 : i32
    return %arg0, %c0_i32, %c0_i32_0 : i32, i32, i32
  }
}

</mosaic_0001>

<bundles_post_ra>
// kernel: tpu_custom_call.1
= control target key start
LH: loop header
LB: loop body
LE: loop exit
PB: predicated region body
PF: predicated region fallthrough
CT: control target
= control target key end

     0   :  { %s2663_s0 = inlined_call_operand.hbm [shape: f32[2,8,32], index: 0, kind: input, shape index: {}]   ;;  %s2664_s1 = inlined_call_operand.vmem [shape: bf16[2,32,96], index: 1, kind: input, shape index: {}]   ;;  %s2665_s2 = inlined_call_operand.hbm [shape: f32[2,1,96], index: 2, kind: input, shape index: {}]   ;;  %s2666_s3 = inlined_call_operand.vmem [shape: bf16[2,32,32], index: 3, kind: input, shape index: {}]   ;;  %s2667_s4 = inlined_call_operand.vmem [shape: f32[2,1,32], index: 4, kind: input, shape index: {}]   ;;  %s2668_s5 = inlined_call_operand.vmem [shape: bf16[2,32,64], index: 5, kind: input, shape index: {}]   ;;  %s2669_s6 = inlined_call_operand.vmem [shape: f32[2,1,64], index: 6, kind: input, shape index: {}]   ;;  %s2670_s7 = inlined_call_operand.vmem [shape: bf16[2,64,32], index: 7, kind: input, shape index: {}]   ;;  %s2671_s8 = inlined_call_operand.vmem [shape: f32[2,1,32], index: 8, kind: input, shape index: {}]   ;;  %s2672_s9 = inlined_call_operand.hbm [shape: f32[2,1,32], index: 9, kind: input, shape index: {}]   ;;  %s2673_s10 = inlined_call_operand.vmem [shape: f32[2,1,32], index: 10, kind: input, shape index: {}]   ;;  %s2674_s11 = inlined_call_operand.hbm [shape: f32[2,1,32], index: 11, kind: input, shape index: {}]   ;;  %s2675_s12 = inlined_call_operand.vmem [shape: f32[2,1,32], index: 12, kind: input, shape index: {}]   ;;  %s2676_s13 = inlined_call_operand.vmem [shape: f32[1,32], index: 13, kind: input, shape index: {}]   ;;  %s2677_s14 = inlined_call_operand.vmem [shape: f32[1,32], index: 14, kind: input, shape index: {}]   ;;  %s2678_s15 = inlined_call_operand.hbm [shape: f32[2,8,32], index: 15, kind: output, shape index: {}]  }
   0x1   :  { %2693 = sst [smem:[#allocation34_spill]] %s2663_s0 }
   0x2   :  { %2694 = sst [smem:[#allocation35_spill]] %s2664_s1 }
   0x3   :  { %2695 = sst [smem:[#allocation36_spill]] %s2665_s2 }
   0x4   :  { %2696 = sst [smem:[#allocation37_spill]] %s2666_s3 }
   0x5   :  { %2697 = sst [smem:[#allocation38_spill]] %s2668_s5 }
   0x6   :  { %2698 = sst [smem:[#allocation39_spill]] %s2669_s6 }
   0x7   :  { %2699 = sst [smem:[#allocation40_spill]] %s2670_s7 }
   0x8   :  { %2700 = sst [smem:[#allocation41_spill]] %s2671_s8 }
   0x9   :  { %2701 = sst [smem:[#allocation42_spill]] %s2672_s9 }
   0xa   :  { %2702 = sst [smem:[#allocation43_spill]] %s2673_s10 }
   0xb   :  { %2703 = sst [smem:[#allocation44_spill]] %s2674_s11 }
   0xc   :  { %2704 = sst [smem:[#allocation45_spill]] %s2675_s12 }
   0xd   :  { %2705 = sst [smem:[#allocation46_spill]] %s2676_s13 }
   0xe   :  { %2706 = sst [smem:[#allocation47_spill]] %s2677_s14 }
   0xf   :  { %2707 = sst [smem:[#allocation48_spill]] %s2678_s15 }
  0x10   :  { %20 = vsyncpa [#allocation8], 0 }
  0x11   :  { %22 = vsyncpa [#allocation8 + $0x1], 0 }
  0x12   :  { %23 = vsyncpa [#allocation11], 0 }
  0x13   :  { %25 = vsyncpa [#allocation11 + $0x1], 0 }
  0x14   :  { %26 = vsyncpa [#allocation14], 0 }
  0x15   :  { %28 = vsyncpa [#allocation14 + $0x1], 0 }
  0x16   :  { %29 = vsyncpa [#allocation9], 0 }
  0x17   :  { %31 = vsyncpa [#allocation9 + $0x1], 0  ;;  %s2243_s18 = smov 0   ;;  %s2245_s19 = smov 0  }
  0x18   :  { %s2247_s20 = smov 0   ;;  %s2249_s21 = smov 0  }
  0x19   :  { %s2251_s22 = smov 0   ;;  %s2253_s23 = smov 0  }
  0x1a   :  { %s2255_s24 = smov 0   ;;  %s2257_s25 = smov 0  }
  0x1b   :  { %s2259_s26 = smov 0   ;;  %s2261_s27 = smov 0  }
  0x1c   :  { %s2263_s28 = smov 0  }
  0x1d LB: > { %2708 = sst [smem:[#allocation20_spill]] %s2110_s19  ;;  %s2297_s29 = sadd.s32 4294967295, %s2146_s28   ;;  %s2146_s28 = sphi %s2263_s28, %s37_s28   ;;  %s2142_s27 = sphi %s2261_s27, %s2768_s27   ;;  %s2138_s26 = sphi %s2259_s26, %s2767_s26   ;;  %s2134_s25 = sphi %s2257_s25, %s2766_s25   ;;  %s2130_s24 = sphi %s2255_s24, %s2765_s24   ;;  %s2126_s23 = sphi %s2253_s23, %s2764_s23   ;;  %s2122_s22 = sphi %s2251_s22, %s2763_s22   ;;  %s2118_s21 = sphi %s2249_s21, %s2762_s21   ;;  %s2114_s20 = sphi %s2247_s20, %s2761_s20   ;;  %s2110_s19 = sphi %s2245_s19, %s2760_s19   ;;  %s2106_s18 = sphi %s2243_s18, %s2759_s18  }
  0x1e   : > { %2709 = sst [smem:[#allocation21_spill]] %s2114_s20  ;;  %s46_s30 = sadd.s32 1, %s2138_s26 }
  0x1f   : > { %2710 = sst [smem:[#allocation22_spill]] %s2118_s21  ;;  %p2300_p0 = scmp.ge.s32.totalorder %s46_s30, 2 }
  0x20   : > { %2711 = sst [smem:[#allocation23_spill]] %s2122_s22  ;;  %p64_p1 = scmp.eq.s32.totalorder %s2146_s28, 0 }
  0x21   : > { %2712 = sst [smem:[#allocation24_spill]] %s2126_s23  ;;  %p70_p2 = scmp.eq.s32.totalorder %s2297_s29, 0 }
  0x22   : > { %2713 = sst [smem:[#allocation25_spill]] %s2134_s25  ;;  %s108_s17 = sadd.s32 1, %s2114_s20 }
  0x23   : > { %2714 = sst [smem:[#allocation26_spill]] %s2138_s26  ;;  %s2770_s30 = smov (%p2300_p0, %s46_s30), 0 }
  0x24   : > { %2715 = sst [smem:[#allocation27_spill]] %s2142_s27  ;;  %p115_p3 = scmp.ne.s32.totalorder %s2114_s20, %s2110_s19 }
  0x25   : > { %2717 = sst [smem:[#allocation28_spill]] %s2770_s30  ;;  %p121_p4 = scmp.ne.s32.totalorder %s2110_s19, %s2106_s18 }
  0x26   : > { %s105_s15 = ssub.s32 %s2138_s26, %s2770_s30  ;;  %p117_p6 = por %p115_p3, %p64_p1 }
  0x27   : > { %p106_p5 = scmp.eq.s32.totalorder %s105_s15, 0  ;;  %p2320_p7 = por %p121_p4, %p70_p2 }
  0x28   : > { %p1757_p8 = scmp.lt.s32.totalorder %s2146_s28, 4  ;;  %s506_s13 = sand.u32 1, %s2146_s28  }
  0x29   : > { %s2326_s14 = scalar_select %p106_p5, %s2114_s20, %s108_s17  }
  0x2a   : > { %s2330_s18 = sand.u32 1, %s2114_s20   ;;  %s2720_s2 = sld [smem:[#allocation36_spill]] }
  0x2b   : > { %2719 = sst [smem:[#allocation29_spill]] %s2326_s14  ;;  %s509_s10 = scalar_lea.vmem [#allocation10], %s2330_s18 }
  0x2c   : > { %s516_s7 = sshll.u32 %s509_s10, 4  ;;  %p2339_p9 = pnand %p1757_p8, %p117_p6  ;;  %s517_s7 = int_to_ptr.vmem [resolvable:$true] %s516_s7 }
  0x2d   : > { %p1643_p10 = scmp.ge.s32.totalorder %s2146_s28, 1  ;;  %p609_p11 = scmp.lt.s32.totalorder %s2146_s28, 5 }
  0x2e   : > { %s2345_s12 = scalar_lea.sflag [#allocation11], %s506_s13  ;;  %s1638_s30 = sadd.s32 4294967294, %s2146_s28  }
  0x2f   : > { %p2350_p12 = pnand %p1643_p10, %p609_p11  ;;  %p63_p13 = scmp.ne.s32.totalorder %s2126_s23, %s2122_s22 }
  0x30   : > { %s512_s15 = scalar_lea.hbm %s2720_s2, %s2138_s26  ;;  %s56_s2 = sadd.s32 1, %s2126_s23 }
  0x31   : > { %s514_s17 = sshll.u32 %s512_s15, 4  ;;  %s49_s15 = sadd.s32 1, %s2142_s27  ;;  %s515_s17 = int_to_ptr.hbm [resolvable:$true] %s514_s17 }
  0x32   : > { %1746 = dma.hbm_to_vmem [thread:$0]  (!%p2339_p9), %s515_s17, 16, %s517_s7, %s2345_s12  }
  0x33   : > { %s2772_s15 = smov (!%p2300_p0, %s49_s15), %s2142_s27  ;;  %p69_p4 = scmp.ne.s32.totalorder %s2122_s22, %s2118_s21 }
  0x34   : > { %p51_p3 = scmp.ge.s32.totalorder %s2772_s15, 2  ;;  %p2366_p5 = por %p64_p1, %p63_p13 }
  0x35   : > { %p447_p6 = scmp.eq.s32.totalorder %s2297_s29, 3  ;;  %p2375_p10 = por %p70_p2, %p69_p4 }
  0x36   : > { %s2774_s15 = smov (%p51_p3, %s2772_s15), 0  ;;  %p453_p1 = scmp.eq.s32.totalorder %s1638_s30, 3 }
  0x37   : > { %2724 = sst [smem:[#allocation30_spill]] %s2774_s15  ;;  %p2379_p0 = por %p447_p6, %p63_p13 }
  0x38   : > { %s53_s17 = ssub.s32 %s2142_s27, %s2774_s15  ;;  %s479_s20 = sand.u32 1, %s2126_s23  }
  0x39   : > { %s2726_s16 = scalar_select %p2379_p0, 1, 0 }
  0x3a   : > { %p54_p11 = scmp.eq.s32.totalorder %s53_s17, 0  ;;  %p2386_p3 = por %p453_p1, %p69_p4 }
  0x3b   : > { %2727 = sst [smem:[#allocation31_spill]] %s2726_s16  ;;  %s1641_s6 = sshll.u32 %s479_s20, 3 }
  0x3c   : > { %s2728_s21 = scalar_select %p2386_p3, 1, 0 }
  0x3d   : > { %s2391_s8 = scalar_select %p54_p11, %s2126_s23, %s56_s2  }
  0x3e   : > { %2729 = sst [smem:[#allocation32_spill]] %s2728_s21  ;;  %s1642_s5 = sshll.u32 %s2142_s27, 3 }
  0x3f   : > { %2730 = sst [smem:[#allocation33_spill]] %s2391_s8  ;;  %s483_s30 = scalar_lea.vmem [#allocation7], %s1641_s6 }
  0x40   : > { %s2731_s0 = sld [smem:[#allocation34_spill]]  ;;  %s491_s17 = sshll.u32 %s483_s30, 4  ;;  %s492_s17 = int_to_ptr.vmem [resolvable:$true] %s491_s17 }
  0x41   : > { %p1741_p2 = pnand %p1757_p8, %p2366_p5  ;;  %s2732_s9 = sld [smem:[#allocation42_spill]] }
  0x42   : > { %s568_s1 = scalar_lea.vmem [#allocation12], %s2330_s18  ;;  %s2733_s11 = sld [smem:[#allocation44_spill]] }
  0x43   : > { %s575_s3 = sshll.u32 %s568_s1, 4  ;;  %s591_s30 = scalar_lea.vmem [#allocation13], %s2330_s18  ;;  %s576_s3 = int_to_ptr.vmem [resolvable:$true] %s575_s3 }
  0x44   : > { %s589_s8 = scalar_lea.sflag [#allocation14], %s2330_s18 }
  0x46   : > { %s487_s16 = scalar_lea.hbm %s2731_s0, %s1642_s5  ;;  %s480_s5 = scalar_lea.sflag [#allocation8], %s479_s20 }
  0x47   : > { %s489_s15 = sshll.u32 %s487_s16, 4  ;;  %s571_s27 = scalar_lea.hbm %s2732_s9, %s2138_s26  ;;  %s490_s15 = int_to_ptr.hbm [resolvable:$true] %s489_s15 }
  0x48   : > { %s573_s23 = sshll.u32 %s571_s27, 4  ;;  %s594_s13 = scalar_lea.hbm %s2733_s11, %s2138_s26  ;;  %s574_s23 = int_to_ptr.hbm [resolvable:$true] %s573_s23 }
  0x49   : > { %1743 = dma.hbm_to_vmem [thread:$0]  (!%p1741_p2), %s490_s15, 128, %s492_s17, %s480_s5  }
  0x4a   : > { %1749 = dma.hbm_to_vmem [thread:$0]  (!%p2339_p9), %s574_s23, 16, %s576_s3, %s2345_s12  }
  0x4b   : > { %s598_s0 = sshll.u32 %s591_s30, 4  ;;  %s596_s21 = sshll.u32 %s594_s13, 4  ;;  %s599_s0 = int_to_ptr.vmem [resolvable:$true] %s598_s0  ;;  %s597_s21 = int_to_ptr.hbm [resolvable:$true] %s596_s21 }
  0x4c   : > { %1752 = dma.hbm_to_vmem [thread:$0]  (!%p2339_p9), %s597_s21, 16, %s599_s0, %s589_s8  }
  0x4d   : > { %613 = sbr.rel (%p2350_p12) target bundleno = 2276 (0x8e4), region = 80  ;;  %s2420_s20 = sand.u32 (!%p2350_p12), 1, %s2122_s22  }
  0x4e   : > { %s2689_s23 = sshll.u32 (!%p2350_p12), %s2420_s20, 3  ;;  %s616_s27 = scalar_lea.sflag (!%p2350_p12), [#allocation8], %s2420_s20 }
  0x4f   : > { %s619_s12 = scalar_lea.vmem (!%p2350_p12), [#allocation7], %s2689_s23 }
  0x52   : > { %2089 = dma.done.wait (%p2375_p10), %s616_s27, 128  }
  0x53   : > { %2091 = vsyncadd (%p2375_p10), %s616_s27, 4294967168  ;;  %s625_s0 = sand.u32 1, %s2297_s29   ;;  %s2432_s14 = sand.u32 1, %s2110_s19  }
  0x54   : > { %s626_s21 = scalar_lea.sflag [#allocation11], %s625_s0 }
  0x55   : > { %2093 = dma.done.wait (%p2320_p7), %s626_s21, 32  }
  0x56   : > { %2095 = vsyncadd (%p2320_p7), %s626_s21, 4294967264  ;;  %s644_s15 = scalar_lea.sflag [#allocation14], %s2432_s14 }
  0x57   : > { %2097 = dma.done.wait (%p2320_p7), %s644_s15, 16  }
  0x58   : > { %2099 = vsyncadd (%p2320_p7), %s644_s15, 4294967280  ;;  %p741_p8 = scmp.lt.s32.totalorder %s2130_s24, 1  ;;  %s2734_s6 = sld [smem:[#allocation35_spill]] }
  0x59   : > { %s2735_s8 = sld [smem:[#allocation37_spill]]  ;;  %s2742_s18 = sshll.u32 %s2420_s20, 3 }
  0x5a   : > { %s2448_s29 = scalar_select %p741_p8, %s2130_s24, 1 }
  0x5b   : > { %s2736_s15 = sld [smem:[#allocation38_spill]]  ;;  %p1654_p7 = scmp.ne.s32.totalorder %s2130_s24, 0 }
  0x5c   : > { %s1716_s17 = sshll.u32 %s2448_s29, 4  ;;  %s2737_s23 = sld [smem:[#allocation39_spill]] }
  0x5d   : > { %s1719_s2 = sshll.u32 %s2448_s29, 5  ;;  %s2738_s11 = sld [smem:[#allocation41_spill]] }
  0x5e   : > { %s745_s16 = scalar_lea.vmem %s2734_s6, %s1716_s17  ;;  %s2739_s26 = sld [smem:[#allocation40_spill]] }
  0x5f   : > { %s2461_s27 = scalar_lea.vmem %s2735_s8, %s1716_s17  ;;  %s2740_s22 = sld [smem:[#allocation43_spill]] }
  0x61   : > { %s2466_s7 = scalar_lea.vmem %s2736_s15, %s1716_s17  ;;  %s2741_s15 = sld [smem:[#allocation45_spill]] }
  0x62   : > { %s761_s9 = scalar_lea.vmem %s2737_s23, %s2448_s29  ;;  %s2492_s23 = scalar_lea.vmem [#allocation15], %s2742_s18 }
  0x63   : > { %s769_s25 = scalar_lea.vmem %s2738_s11, %s2448_s29  ;;  %780 = sbr.rel (%p1654_p7) target bundleno = 106 (0x6a), region = 100 }
  0x64   : > { %s2480_s13 = scalar_lea.vmem %s2739_s26, %s1719_s2 }
  0x65   : > { %s772_s0 = scalar_lea.vmem %s2740_s22, %s2448_s29 }
  0x67   : > { %s775_s19 = scalar_lea.vmem %s2741_s15, %s2448_s29 }
  0x68   : > { %v781_v0 = vld [vmem:[%s619_s12] sm:$0xff]  ;;  %vm782_vm0 = vcmask 261120  }
  0x69   : > { %783 = vst.msk [vmem:[#allocation2] sm:$0xff] %vm782_vm0, %v781_v0 }
  0x6a PF: > { %v1721_v1 = vld [vmem:[%s745_s16 + $0x8] sm:$0xff]  ;;  %v1720_v2 = vld [vmem:[%s745_s16] sm:$0xff]  ;;  %vm806_vm1 = vcmask 261120   ;;  %s2743_s11 = scalar_lea.vmem [#allocation10], %s2432_s14  ;;  %vm824_vm2 = vcmask 64512   ;;  %s2148_s22 = smov 72  }
  0x6b   : > { %816 = vmatpush.bf16.msra.mxu0 %v1721_v1  ;;  %v1862_v5 = vld [vmem:[%s2743_s11] ss:$0 sm:$0xff]  ;;  %s2149_s26 = smov 96   ;;  %s2150_s12 = smov 120   ;;  %vm1138_vm3 = vcmask 130112   ;;  %vm1144_vm4 = vcmask 195712  }
  0x6c   : > { %s2151_s10 = smov 88   ;;  %s2152_s3 = smov 112   ;;  %vm1150_vm5 = vcmask 261312   ;;  %vm1305_vm10 = vcmask 523264  }
  0x6d   : > { %s2153_s16 = smov 80   ;;  %s2154_s2 = smov 104  }
  0x6e   : > { %s2155_s1 = smov 56   ;;  %s2156_s5 = smov 64  }
  0x6f   : > { %817 = vmatpush.bf16.msra.mxu0 %v1720_v2  ;;  %s2157_s6 = smov 48   ;;  %s2158_s30 = smov 40  }
  0x70   : > { %v2495_v3 = vld [vmem:[#allocation2] sm:$0xff]  ;;  %s2159_s8 = smov 8   ;;  %s2160_s17 = smov 16  }
  0x71   : > { %v785_v4 = vpack.c.bf16 %v2495_v3, %v2495_v3  ;;  %s2161_s21 = smov 24   ;;  %s2744_s11 = scalar_lea.vmem %s2667_s4, %s2448_s29 }
  0x72   : > { %p1711_p9 = scmp.ne.s32.totalorder %s2130_s24, 1 }
  0x73   : > { %1663 = vmatmul.msk.bf16.vlgmr.msra.gmra.mxu0 %vm806_vm1, %v785_v4 }
  0xf0   : > { %v819_v6 = vpop.f32.mrf.mxu0 }
  0xf1   : > { %v2502_v7 = vadd.f32 %v1862_v5, %v819_v6 }
  0xf3   : > { %871 = vrot.lane.b32.xlu2 %v2502_v7, %s2148_s22  ;;  %827 = vrot.lane.b32.xlu0 %v2502_v7, %s2149_s26  ;;  %v823_v8 = vmul.f32 0.35355338, %v2502_v7 }
  0xf5   : > { %836 = vrot.lane.b32.xlu1 %v823_v8, %s2150_s12  ;;  %825 = vst.msk [vmem:[#allocation3] sm:$0xff] %vm824_vm2, %v823_v8 }
  0xf8   : > { %v821_v9 = vpop.f32.mrf.mxu0 }
  0xfb   : > { %841 = vrot.lane.b32.xlu0 %v2502_v7, %s2151_s10  ;;  %851 = vrot.lane.b32.xlu2 %v823_v8, %s2152_s3 }
  0xfc   : > { %v881_v18 = vld [vmem:[#allocation3] sm:$0xff] }
  0xfd   : > { %856 = vrot.lane.b32.xlu1 %v2502_v7, %s2153_s16 }
 0x103   : > { %866 = vrot.lane.b32.xlu0 %v823_v8, %s2154_s2 }
 0x14d   : > { %v872_v10 = vpop.permute.xlu2 %871 }
 0x14e   : > { %875 = vst.msk [vmem:[#allocation4 + $0x18] sm:$0xff] %vm824_vm2, %v872_v10 }
 0x155   : > { %v852_v11 = vpop.permute.xlu2 %851  ;;  %v888_v12 = vld [vmem:[#allocation4 + $0x18] sm:$0xff] }
 0x156   : > { %855 = vst.msk [vmem:[#allocation3 + $0x10] sm:$0xff] %vm824_vm2, %v852_v11  ;;  %1670 = vmatpush.xpose.msk.msra.mxu1 %vm824_vm2, %v888_v12 }
 0x15d   : > { %v883_v23 = vld [vmem:[#allocation3 + $0x10] sm:$0xff] }
 0x165   : > { %v828_v13 = vpop.permute.xlu0 %827 }
 0x166   : > { %830 = vst.msk [vmem:[#allocation4] sm:$0xff] %vm824_vm2, %v828_v13 }
 0x167   : > { %v837_v14 = vpop.permute.xlu1 %836 }
 0x168   : > { %840 = vst.msk [vmem:[#allocation3 + $0x8] sm:$0xff] %vm824_vm2, %v837_v14  ;;  %v1723_v14 = vld [vmem:[%s2461_s27 + $0x8] sm:$0xff] }
 0x16d   : > { %v842_v15 = vpop.permute.xlu0 %841  ;;  %v885_v16 = vld [vmem:[#allocation4] sm:$0xff] }
 0x16e   : > { %845 = vst.msk [vmem:[#allocation4 + $0x8] sm:$0xff] %vm824_vm2, %v842_v15  ;;  %1664 = vmatpush.xpose.msk.msra.mxu2 %vm824_vm2, %v885_v16  ;;  %v1722_v15 = vld [vmem:[%s2461_s27] sm:$0xff] }
 0x16f   : > { %v857_v17 = vpop.permute.xlu1 %856  ;;  %v882_v22 = vld [vmem:[#allocation3 + $0x8] sm:$0xff] }
 0x170   : > { %860 = vst.msk [vmem:[#allocation4 + $0x10] sm:$0xff] %vm824_vm2, %v857_v17 }
 0x171   : > { %1665 = vmatmul.msk.f32.vlgmr.msra.gmra.mxu2 %vm824_vm2, %v881_v18 }
 0x175   : > { %v867_v19 = vpop.permute.xlu0 %866  ;;  %v886_v20 = vld [vmem:[#allocation4 + $0x8] sm:$0xff] }
 0x176   : > { %870 = vst.msk [vmem:[#allocation3 + $0x18] sm:$0xff] %vm824_vm2, %v867_v19  ;;  %1666 = vmatpush.xpose.msk.msrb.mxu2 %vm824_vm2, %v886_v20 }
 0x177   : > { %v887_v21 = vld [vmem:[#allocation4 + $0x10] sm:$0xff] }
 0x178   : > { %1668 = vmatpush.xpose.msk.msra.mxu3 %vm824_vm2, %v887_v21  ;;  %v1863_v21 = vld [vmem:[%s2744_s11] ss:$0 sm:$0xff] }
 0x179   : > { %1667 = vmatmul.msk.f32.vlgmr.msrb.gmra.mxu2 %vm824_vm2, %v882_v22 }
 0x17b   : > { %1669 = vmatmul.msk.f32.vlgmr.msra.gmra.mxu3 %vm824_vm2, %v883_v23 }
 0x17d   : > { %v884_v24 = vld [vmem:[#allocation3 + $0x18] sm:$0xff] }
 0x17e   : > { %1671 = vmatmul.msk.f32.vlgmr.msra.gmra.mxu1 %vm824_vm2, %v884_v24 }
 0x1f4   : > { %v916_v25 = vpop.f32.mrf.mxu2 }
 0x1f5   : > { %v997_v26 = vsel %vm824_vm2, %v916_v25, -inf }
 0x1f6   : > { %998 = vmax.xlane.f32.xlu1 %v997_v26 }
 0x1fb   : > { %v994_v27 = vpop.f32.mrf.mxu1 }
 0x1fc   : > { %v1006_v28 = vsel %vm824_vm2, %v994_v27, -inf  ;;  %v942_v31 = vpop.f32.mrf.mxu2 }
 0x1fd   : > { %1007 = vmax.xlane.f32.xlu0 %v1006_v28  ;;  %v1000_v32 = vsel %vm824_vm2, %v942_v31, -inf }
 0x1fe   : > { %v968_v29 = vpop.f32.mrf.mxu3 }
 0x1ff   : > { %v1003_v30 = vsel %vm824_vm2, %v968_v29, -inf }
 0x200   : > { %1004 = vmax.xlane.f32.xlu2 %v1003_v30 }
 0x208   : > { %1001 = vmax.xlane.f32.xlu2 %v1000_v32 }
 0x20f   : > { %846 = vrot.lane.b32.xlu1 %v2502_v7, %s2155_s1 }
 0x220   : > { %831 = vrot.lane.b32.xlu2 %v2502_v7, %s2156_s5 }
 0x269   : > { %v999_v33 = vpop.xlane.xlu1 %998 }
 0x26a   : > { %v1009_v34 = vsub.f32 %v916_v25, %v999_v33 }
 0x26c   : > { %v1013_v35 = vmul.f32 1.442695, %v1009_v34 }
 0x26e   : > { %1870 = vpow2.f32 %v1013_v35 }
 0x270   : > { %v1008_v36 = vpop.xlane.xlu0 %1007 }
 0x271   : > { %v1012_v37 = vsub.f32 %v994_v27, %v1008_v36  ;;  %v2162_v27 = vmov 32.0  }
 0x273   : > { %v1019_v38 = vmul.f32 1.442695, %v1012_v37  ;;  %v1005_v39 = vpop.xlane.xlu2 %1004 }
 0x274   : > { %v1871_v40 = vpop.eup %1870  ;;  %v1011_v41 = vsub.f32 %v968_v29, %v1005_v39  ;;  %v1724_v39 = vld [vmem:[%s2466_s7] sm:$0xff] }
 0x275   : > { %1872 = vpow2.f32 %v1019_v38  ;;  %v1021_v42 = vsel %vm824_vm2, %v1871_v40, 0.0  ;;  %v1725_v38 = vld [vmem:[%s2466_s7 + $0x8] sm:$0xff]  ;;  %s2745_s7 = scalar_lea.vmem [#allocation12], %s2432_s14 }
 0x276   : > { %v1017_v43 = vmul.f32 1.442695, %v1011_v41  ;;  %1022 = vadd.xlane.f32.xlu1 %v1021_v42  ;;  %1260 = vmatpush.bf16.msrb.mxu0 %v1725_v38 }
 0x278   : > { %1874 = vpow2.f32 %v1017_v43  ;;  %v1728_v43 = vld [vmem:[%s2480_s13 + $0x10] sm:$0xff] }
 0x27a   : > { %1261 = vmatpush.bf16.msrb.mxu0 %v1724_v39 }
 0x27b   : > { %v1873_v44 = vpop.eup %1872  ;;  %v1002_v45 = vpop.xlane.xlu2 %1001 }
 0x27c   : > { %v1010_v46 = vsub.f32 %v942_v31, %v1002_v45  ;;  %v1030_v47 = vsel %vm824_vm2, %v1873_v44, 0.0 }
 0x27d   : > { %1031 = vadd.xlane.f32.xlu0 %v1030_v47 }
 0x27e   : > { %v1875_v48 = vpop.eup %1874  ;;  %v1015_v49 = vmul.f32 1.442695, %v1010_v46 }
 0x27f   : > { %v1027_v50 = vsel %vm824_vm2, %v1875_v48, 0.0 }
 0x280   : > { %1876 = vpow2.f32 %v1015_v49  ;;  %1028 = vadd.xlane.f32.xlu2 %v1027_v50 }
 0x281   : > { %v847_v51 = vpop.permute.xlu1 %846 }
 0x282   : > { %850 = vst.msk [vmem:[#allocation5 + $0x8] sm:$0xff] %vm824_vm2, %v847_v51  ;;  %v1864_v51 = vld [vmem:[%s2745_s7] ss:$0 sm:$0xff] }
 0x283   : > { %v832_v52 = vpop.permute.xlu2 %831 }
 0x284   : > { %834 = vst.msk [vmem:[#allocation5] sm:$0xff] %vm824_vm2, %v832_v52 }
 0x286   : > { %v1877_v53 = vpop.eup %1876 }
 0x287   : > { %v1024_v54 = vsel %vm824_vm2, %v1877_v53, 0.0 }
 0x288   : > { %1025 = vadd.xlane.f32.xlu0 %v1024_v54  ;;  %v1865_v54 = vld [vmem:[%s772_s0] ss:$0 sm:$0xff] }
 0x289   : > { %v890_v55 = vld [vmem:[#allocation5 + $0x8] sm:$0xff] }
 0x28a   : > { %1082 = vmatpush.msrb.mxu3 %v890_v55 }
 0x28b   : > { %v889_v56 = vld [vmem:[#allocation5] sm:$0xff] }
 0x28c   : > { %1059 = vmatpush.msra.mxu2 %v889_v56  ;;  %1183 = vmatpush.bf16.msra.mxu3 %v1723_v14 }
 0x28f   : > { %861 = vrot.lane.b32.xlu1 %v2502_v7, %s2157_s6  ;;  %s2752_s6 = sld [smem:[#allocation47_spill]] (!%p1711_p9) }
 0x290   : > { %1184 = vmatpush.bf16.msra.mxu3 %v1722_v15 }
 0x29c   : > { %876 = vrot.lane.b32.xlu0 %v2502_v7, %s2158_s30 }
 0x2e9   : > { %v1023_v57 = vpop.xlane.xlu1 %1022 }
 0x2ea   : > { %1878 = vrcp.f32 %v1023_v57 }
 0x2f0   : > { %v1879_v58 = vpop.eup %1878  ;;  %v1032_v60 = vpop.xlane.xlu0 %1031 }
 0x2f1   : > { %v1037_v59 = vmul.f32 %v1879_v58, %v1871_v40  ;;  %v1729_v40 = vld [vmem:[%s2480_s13 + $0x18] sm:$0xff]  ;;  %v1727_v58 = vld [vmem:[%s2480_s13 + $0x8] sm:$0xff] }
 0x2f3   : > { %1672 = vmatmul.msk.f32.vlgmr.msra.gmra.mxu2 %vm824_vm2, %v1037_v59  ;;  %v1029_v62 = vpop.xlane.xlu2 %1028  ;;  %v1726_v59 = vld [vmem:[%s2480_s13] sm:$0xff] }
 0x2fb   : > { %v1026_v61 = vpop.xlane.xlu0 %1025 }
 0x2fc   : > { %1880 = vrcp.f32 %v1026_v61 }
 0x2fd   : > { %1882 = vrcp.f32 %v1029_v62 }
 0x2fe   : > { %1884 = vrcp.f32 %v1032_v60  ;;  %v1866_v60 = vld [vmem:[%s761_s9] ss:$0 sm:$0xff]  ;;  %s2749_s9 = scalar_lea.vmem [#allocation13], %s2432_s14  ;;  %s2751_s14 = sld [smem:[#allocation46_spill]] (!%p1711_p9) }
 0x2ff   : > { %1886 = vrcp.f32 %v2162_v27 }
 0x301   : > { %v862_v63 = vpop.permute.xlu1 %861 }
 0x302   : > { %v1881_v0 = vpop.eup %1880  ;;  %865 = vst.msk [vmem:[#allocation5 + $0x10] sm:$0xff] %vm824_vm2, %v862_v63 }
 0x303   : > { %v1038_v1 = vmul.f32 %v1881_v0, %v1877_v53  ;;  %v1883_v2 = vpop.eup %1882 }
 0x304   : > { %v1039_v5 = vmul.f32 %v1883_v2, %v1875_v48  ;;  %v1885_v7 = vpop.eup %1884  ;;  %v1867_v2 = vld [vmem:[%s769_s25] ss:$0 sm:$0xff] }
 0x305   : > { %1673 = vmatmul.msk.f32.vlgmr.msrb.gmra.mxu3 %vm824_vm2, %v1038_v1  ;;  %v1040_v8 = vmul.f32 %v1885_v7, %v1873_v44  ;;  %v1887_v28 = vpop.eup %1886 }
 0x306   : > { %v1197_v29 = vmul.f32 32.0, %v1887_v28  ;;  %vm1201_vm6 = vweird.f32 %v1887_v28 }
 0x308   : > { %v1198_v30 = vsub.f32 1.0, %v1197_v29 }
 0x309   : > { %v891_v4 = vld [vmem:[#allocation5 + $0x10] sm:$0xff] }
 0x30a   : > { %1105 = vmatpush.msrb.mxu1 %v891_v4  ;;  %v1199_v31 = vmul.f32 %v1887_v28, %v1198_v30 }
 0x30b   : > { %1674 = vmatmul.msk.f32.vlgmr.msrb.gmra.mxu1 %vm824_vm2, %v1039_v5 }
 0x30c   : > { %v1200_v32 = vadd.f32 %v1887_v28, %v1199_v31  ;;  %1313 = vmatpush.bf16.msra.mxu1 %v1729_v40 }
 0x30e   : > { %v877_v6 = vpop.permute.xlu0 %876  ;;  %v2556_v33 = vsel %vm1201_vm6, %v1887_v28, %v1200_v32 }
 0x30f   : > { %880 = vst.msk [vmem:[#allocation5 + $0x18] sm:$0xff] %vm824_vm2, %v877_v6 }
 0x310   : > { %1314 = vmatpush.bf16.msra.mxu1 %v1728_v43 }
 0x314   : > { %1315 = vmatpush.bf16.msra.mxu1 %v1727_v58 }
 0x316   : > { %v892_v9 = vld [vmem:[#allocation5 + $0x18] sm:$0xff] }
 0x317   : > { %1128 = vmatpush.msrb.mxu2 %v892_v9 }
 0x318   : > { %1675 = vmatmul.msk.f32.vlgmr.msrb.gmra.mxu2 %vm824_vm2, %v1040_v8  ;;  %1316 = vmatpush.bf16.msra.mxu1 %v1726_v59 }
 0x376   : > { %v1061_v10 = vpop.f32.mrf.mxu2 }
 0x377   : > { %1133 = vst.msk [vmem:[#allocation6] sm:$0xff] %vm824_vm2, %v1061_v10 }
 0x388   : > { %v1084_v11 = vpop.f32.mrf.mxu3  ;;  %v1107_v12 = vpop.f32.mrf.mxu1 }
 0x389   : > { %1135 = vrot.lane.b32.xlu1 %v1084_v11, %s2159_s8  ;;  %1141 = vrot.lane.b32.xlu0 %v1107_v12, %s2160_s17 }
 0x39b   : > { %v1130_v13 = vpop.f32.mrf.mxu2 }
 0x39c   : > { %1147 = vrot.lane.b32.xlu1 %v1130_v13, %s2161_s21 }
 0x3fb   : > { %v1136_v16 = vpop.permute.xlu1 %1135  ;;  %v1142_v17 = vpop.permute.xlu0 %1141 }
 0x3fc   : > { %1139 = vst.msk [vmem:[#allocation6] sm:$0xff] %vm1138_vm3, %v1136_v16 }
 0x3fd   : > { %1145 = vst.msk [vmem:[#allocation6] sm:$0xff] %vm1144_vm4, %v1142_v17 }
 0x40e   : > { %v1148_v18 = vpop.permute.xlu1 %1147 }
 0x40f   : > { %1151 = vst.msk [vmem:[#allocation6] sm:$0xff] %vm1150_vm5, %v1148_v18 }
 0x416   : > { %v1152_v19 = vld [vmem:[#allocation6] sm:$0xff] }
 0x417   : > { %v1153_v20 = vpack.c.bf16 %v1152_v19, %v1152_v19 }
 0x419   : > { %1684 = vmatmul.msk.bf16.vlgmr.msra.gmra.mxu3 %vm806_vm1, %v1153_v20 }
 0x49c   : > { %v1186_v22 = vpop.f32.mrf.mxu3 }
 0x49d   : > { %v1187_v23 = vadd.f32 %v1863_v21, %v1186_v22 }
 0x49f   : > { %v1190_v24 = vadd.f32 %v1187_v23, %v2495_v3  ;;  %v1868_v23 = vld [vmem:[%s2749_s9] ss:$0 sm:$0xff] }
 0x4a1   : > { %v1193_v25 = vsel %vm806_vm1, %v1190_v24, 0.0 }
 0x4a2   : > { %1194 = vadd.xlane.f32.xlu0 %v1193_v25  ;;  %v1869_v25 = vld [vmem:[%s775_s19] ss:$0 sm:$0xff] }
 0x4a4   : > { %v1188_v26 = vpop.f32.mrf.mxu3 }
 0x515   : > { %v1195_v34 = vpop.xlane.xlu0 %1194 }
 0x516   : > { %v1203_v3 = vmul.f32 %v2556_v33, %v1195_v34 }
 0x518   : > { %v1204_v35 = vsub.f32 %v1190_v24, %v1203_v3 }
 0x51a   : > { %v1205_v36 = vmul.f32 %v1204_v35, %v1204_v35 }
 0x51c   : > { %v1206_v37 = vsel %vm806_vm1, %v1205_v36, 0.0 }
 0x51d   : > { %1207 = vadd.xlane.f32.xlu1 %v1206_v37 }
 0x590   : > { %v1208_v41 = vpop.xlane.xlu1 %1207 }
 0x591   : > { %v1209_v42 = vmul.f32 %v1208_v41, %v2556_v33 }
 0x593   : > { %v1210_v44 = vadd.f32 1e-05, %v1209_v42 }
 0x595   : > { %1888 = vrsqrt.f32 %v1210_v44  ;;  %vm1217_vm8 = vweird.f32 %v1210_v44 }
 0x59b   : > { %v1889_v45 = vpop.eup %1888 }
 0x59c   : > { %v1212_v46 = vmul.f32 %v1889_v45, %v1210_v44  ;;  %vm1218_vm7 = vweird.f32 %v1889_v45 }
 0x59d   : > { %vm1219_vm9 = vmor %vm1217_vm8, %vm1218_vm7 }
 0x59e   : > { %v1213_v47 = vmul.f32 %v1889_v45, %v1212_v46 }
 0x5a0   : > { %v1214_v48 = vmul.f32 0.5, %v1213_v47 }
 0x5a2   : > { %v1215_v49 = vsub.f32 1.5, %v1214_v48 }
 0x5a4   : > { %v1216_v50 = vmul.f32 %v1889_v45, %v1215_v49 }
 0x5a6   : > { %v1220_v52 = vsel %vm1219_vm9, %v1889_v45, %v1216_v50 }
 0x5a7   : > { %v1221_v53 = vmul.f32 %v1220_v52, %v1204_v35 }
 0x5a9   : > { %v1225_v55 = vmul.f32 %v1864_v51, %v1221_v53 }
 0x5ab   : > { %v1229_v56 = vadd.f32 %v1865_v54, %v1225_v55 }
 0x5ad   : > { %v1230_v57 = vpack.c.bf16 %v1229_v56, %v1229_v56 }
 0x5af   : > { %1693 = vmatmul.msk.bf16.vlgmr.msrb.gmra.mxu0 %vm806_vm1, %v1230_v57 }
 0x62c   : > { %v1263_v61 = vpop.f32.mrf.mxu0 }
 0x62d   : > { %v1264_v62 = vadd.f32 %v1866_v60, %v1263_v61 }
 0x62f   : > { %v1267_v63 = vmax.f32 %v1264_v62, 0.0 }
 0x631   : > { %v1268_v0 = vpack.c.bf16 %v1267_v63, %v1267_v63 }
 0x633   : > { %1710 = vmatmul.msk.bf16.vlgmr.msra.gmra.mxu1 %vm1305_vm10, %v1268_v0 }
 0x634   : > { %v1265_v1 = vpop.f32.mrf.mxu0 }
 0x6b0   : > { %v1318_v4 = vpop.f32.mrf.mxu1 }
 0x6b1   : > { %v1319_v5 = vadd.f32 %v1867_v2, %v1318_v4 }
 0x6b3   : > { %v1322_v6 = vadd.f32 %v1319_v5, %v1229_v56 }
 0x6b5   : > { %v1325_v7 = vsel %vm806_vm1, %v1322_v6, 0.0 }
 0x6b6   : > { %1326 = vadd.xlane.f32.xlu2 %v1325_v7 }
 0x6b8   : > { %v1320_v8 = vpop.f32.mrf.mxu1 }
 0x729   : > { %v1327_v9 = vpop.xlane.xlu2 %1326 }
 0x72a   : > { %v1328_v10 = vmul.f32 %v1327_v9, %v2556_v33 }
 0x72c   : > { %v1329_v11 = vsub.f32 %v1322_v6, %v1328_v10 }
 0x72e   : > { %v1330_v12 = vmul.f32 %v1329_v11, %v1329_v11 }
 0x730   : > { %v1331_v13 = vsel %vm806_vm1, %v1330_v12, 0.0 }
 0x731   : > { %1332 = vadd.xlane.f32.xlu2 %v1331_v13 }
 0x7a4   : > { %v1333_v14 = vpop.xlane.xlu2 %1332 }
 0x7a5   : > { %v1334_v15 = vmul.f32 %v1333_v14, %v2556_v33 }
 0x7a7   : > { %v1335_v16 = vadd.f32 1e-05, %v1334_v15 }
 0x7a9   : > { %1890 = vrsqrt.f32 %v1335_v16  ;;  %vm1342_vm12 = vweird.f32 %v1335_v16 }
 0x7af   : > { %v1891_v17 = vpop.eup %1890 }
 0x7b0   : > { %v1337_v18 = vmul.f32 %v1891_v17, %v1335_v16  ;;  %vm1343_vm11 = vweird.f32 %v1891_v17 }
 0x7b1   : > { %vm1344_vm13 = vmor %vm1342_vm12, %vm1343_vm11 }
 0x7b2   : > { %v1338_v19 = vmul.f32 %v1891_v17, %v1337_v18 }
 0x7b4   : > { %v1339_v20 = vmul.f32 0.5, %v1338_v19 }
 0x7b6   : > { %v1340_v21 = vsub.f32 1.5, %v1339_v20 }
 0x7b8   : > { %v1341_v22 = vmul.f32 %v1891_v17, %v1340_v21 }
 0x7ba   : > { %v1345_v24 = vsel %vm1344_vm13, %v1891_v17, %v1341_v22 }
 0x7bb   : > { %v1346_v26 = vmul.f32 %v1345_v24, %v1329_v11 }
 0x7bd   : > { %v1350_v27 = vmul.f32 %v1868_v23, %v1346_v26  ;;  %1359 = sbr.rel (%p1711_p9) target bundleno = 2255 (0x8cf), region = 104 }
 0x7bf   : > { %v1354_v28 = vadd.f32 %v1869_v25, %v1350_v27 }
 0x7c1   : > { %1355 = vst.msk [vmem:[#allocation2] sm:$0xff] %vm806_vm1, %v1354_v28 }
 0x7c2   : > { %v1362_v29 = vsel %vm806_vm1, %v1354_v28, 0.0  ;;  %v1892_v44 = vld [vmem:[%s2751_s14] ss:$0 sm:$0xff] }
 0x7c3   : > { %1363 = vadd.xlane.f32.xlu0 %v1362_v29 }
 0x836   : > { %v1364_v30 = vpop.xlane.xlu0 %1363 }
 0x837   : > { %v1365_v31 = vmul.f32 %v1364_v30, %v2556_v33 }
 0x839   : > { %v1366_v32 = vsub.f32 %v1354_v28, %v1365_v31 }
 0x83b   : > { %v1367_v34 = vmul.f32 %v1366_v32, %v1366_v32 }
 0x83d   : > { %v1368_v3 = vsel %vm806_vm1, %v1367_v34, 0.0 }
 0x83e   : > { %1369 = vadd.xlane.f32.xlu0 %v1368_v3 }
 0x8b1   : > { %v1370_v35 = vpop.xlane.xlu0 %1369 }
 0x8b2   : > { %v1371_v36 = vmul.f32 %v1370_v35, %v2556_v33  ;;  %v1893_v33 = vld [vmem:[%s2752_s6] ss:$0 sm:$0xff] }
 0x8b4   : > { %v1372_v37 = vadd.f32 1e-05, %v1371_v36 }
 0x8b6   : > { %1894 = vrsqrt.f32 %v1372_v37  ;;  %vm1379_vm15 = vweird.f32 %v1372_v37 }
 0x8bc   : > { %v1895_v38 = vpop.eup %1894 }
 0x8bd   : > { %v1374_v39 = vmul.f32 %v1895_v38, %v1372_v37  ;;  %vm1380_vm14 = vweird.f32 %v1895_v38 }
 0x8be   : > { %vm1381_vm0 = vmor %vm1379_vm15, %vm1380_vm14 }
 0x8bf   : > { %v1375_v40 = vmul.f32 %v1895_v38, %v1374_v39 }
 0x8c1   : > { %v1376_v41 = vmul.f32 0.5, %v1375_v40 }
 0x8c3   : > { %v1377_v42 = vsub.f32 1.5, %v1376_v41 }
 0x8c5   : > { %v1378_v43 = vmul.f32 %v1895_v38, %v1377_v42 }
 0x8c7   : > { %v1382_v45 = vsel %vm1381_vm0, %v1895_v38, %v1378_v43 }
 0x8c8   : > { %v1383_v46 = vmul.f32 %v1382_v45, %v1366_v32 }
 0x8ca   : > { %v1387_v47 = vmul.f32 %v1892_v44, %v1383_v46 }
 0x8cc   : > { %v1391_v48 = vadd.f32 %v1893_v33, %v1387_v47 }
 0x8ce   : > { %1392 = vst.msk [vmem:[%s2492_s23] sm:$0xff] %vm806_vm1, %v1391_v48 }
 0x8cf PF: > { %s2753_s30 = sld [smem:[#allocation25_spill]]  ;;  %s1406_s27 = sshll.u32 %s2492_s23, 4  ;;  %s1407_s27 = int_to_ptr.vmem [resolvable:$true] %s1406_s27 }
 0x8d0   : > { %s2755_s18 = sld [smem:[#allocation48_spill]]  ;;  %s1394_s26 = scalar_lea.sflag [#allocation9], %s2420_s20 }
 0x8d5   : > { %s1713_s17 = sshll.u32 %s2753_s30, 3 }
 0x8d6   : > { %s2756_s11 = smov %s2755_s18  ;;  %s1404_s7 = scalar_lea.hbm %s2755_s18, %s1713_s17 }
 0x8d7   : > { %s1408_s22 = sshll.u32 %s1404_s7, 4  ;;  %s2036_s16 = scalar_lea.hbm %s2756_s11, 16  ;;  %s1409_s22 = int_to_ptr.hbm [resolvable:$true] %s1408_s22 }
 0x8d8   : > { %s2030_s12 = sshra.s32 %s1409_s22, 4  ;;  %s2031_s12 = int_to_ptr.hbm [resolvable:$true] %s2030_s12 }
 0x8d9   : > { %s2032_s10 = scalar_lea.hbm %s2031_s12, 8  ;;  %p2037_p5 = scmp.lt.s32.totalorder %s2031_s12, %s2756_s11 }
 0x8da   : > { %p2033_p12 = scmp.ne.s32.totalorder %s2031_s12, %s2032_s10  ;;  %p2038_p6 = scmp.lt.s32.totalorder %s2036_s16, %s2032_s10 }
 0x8dc   : > { %p2034_p13 = pnand %p2033_p12, %p2379_p0  ;;  %p2039_p10 = por %p2038_p6, %p2037_p5 }
 0x8de   : > { %p2035_p4 = pneg %p2034_p13 }
 0x8e0   : > { %p2040_p1 = pnand %p2039_p10, %p2035_p4 }
 0x8e2   : > { %2043 = shalt.err (!%p2040_p1)
}
 0x8e3   : > { %1738 = dma.vmem_to_hbm [thread:$0]  (%p2379_p0), %s1407_s27, 128, %s1409_s22, %s1394_s26  }
 0x8e4 PF: > { %s2757_s20 = sld [smem:[#allocation22_spill]]  ;;  %p1758_p11 = scmp.ge.s32.totalorder %s2146_s28, 2 }
 0x8e6   : > { %p1754_p2 = pnand %p1758_p11, %p2386_p3 }
 0x8e8   : > { %p1755_p8 = pneg %p1754_p2 }
 0x8ea   : > { %s1420_s25 = sand.u32 1, %s2757_s20  }
 0x8eb   : > { %s1421_s13 = scalar_lea.sflag [#allocation9], %s1420_s25 }
 0x8ec   : > { %2101 = dma.done.wait (%p1755_p8), %s1421_s13, 128  }
 0x8ed   : > { %2103 = vsyncadd (%p1755_p8), %s1421_s13, 4294967168  ;;  %s37_s28 = sadd.s32 1, %s2146_s28   ;;  %s2759_s18 = sld [smem:[#allocation20_spill]] }
 0x8ee   : > { %p34_p7 = scmp.ge.s32.totalorder %s37_s28, 6   ;;  %s2760_s19 = sld [smem:[#allocation21_spill]] }
 0x8ef   : > { %s2761_s20 = sld [smem:[#allocation29_spill]] }
 0x8f0   : > { %s2762_s21 = sld [smem:[#allocation23_spill]] }
 0x8f1   : > { %s2763_s22 = sld [smem:[#allocation24_spill]] }
 0x8f2   : > { %s2764_s23 = sld [smem:[#allocation33_spill]]  ;;  %36 = sbr.rel (!%p34_p7) target bundleno = 29 (0x1d), region = 206 }
 0x8f3   : > { %s2765_s24 = sld [smem:[#allocation26_spill]] }
 0x8f4   : > { %s2766_s25 = sld [smem:[#allocation27_spill]] }
 0x8f5   : > { %s2767_s26 = sld [smem:[#allocation28_spill]] }
 0x8f6   : > { %s2768_s27 = sld [smem:[#allocation30_spill]] }
 0x8f7   :  { %1427 = vsyncpa [#allocation8], 1 }
 0x8f8   :  { %1429 = vsyncpa [#allocation8 + $0x1], 1 }
 0x8f9   :  { %1430 = vsyncpa [#allocation11], 1 }
 0x8fa   :  { %1432 = vsyncpa [#allocation11 + $0x1], 1 }
 0x8fb   :  { %1433 = vsyncpa [#allocation14], 1 }
 0x8fc   :  { %1435 = vsyncpa [#allocation14 + $0x1], 1 }
 0x8fd   :  { %1436 = vsyncpa [#allocation9], 1 }
 0x8fe   :  { %1438 = vsyncpa [#allocation9 + $0x1], 1 }

</bundles_post_ra>
